<compile_context>
chip_gen: v7x
topology: tpu7x:2x2x1
jax: 0.10.0
libtpu: 0.0.40
codegen_flags: <defaults>
</compile_context>

<pallas_src>
import functools

import jax
import jax.numpy as jnp
from jax.experimental import pallas as pl
from jax.experimental.pallas import tpu as pltpu

HID = 21      # embedding / hidden size
OUT = 10      # fc1 output size (digit logits)
EMB = 10      # number of digit ids / embedding rows

# Packed-weight buffer layout: (PACK_ROWS, PACK_COLS) f32; biases live in the
# last row, directly below their weight's column band.
_C_EMB = 0                       # embed block-diag       (20, 42)
_C_PRO = _C_EMB + 2 * HID        # 42  prologue fused W   (42, 84) + bias
_C_GI = _C_PRO + 4 * HID         # 126 recurrent input W  (21, 63) + bias
_C_GH = _C_GI + 3 * HID          # 189 recurrent hidden W (21, 63) + bias
_C_FC2 = _C_GH + 3 * HID         # 252 fc2                (21, 21) + bias
_C_FC1 = _C_FC2 + HID            # 273 fc1                (21, 10) + bias
PACK_COLS = _C_FC1 + OUT         # 283
PACK_ROWS = 2 * HID + 1          # 43 = 42 weight rows + 1 bias row
BIAS_ROW = PACK_ROWS - 1


def _fused_rnn_kernel(seq_len, batch, ids_ref, w_ref, z_ref):
    """Whole-sequence kernel (single invocation).

    ids_ref : (S*B, 2) int32   packed [x_id | y_id] per time-major row
    w_ref   : (43, 283) f32    packed weights/biases (layout above)
    z_ref   : (S*B, 10) f32    fc1 logits, written once
    """
    sb = seq_len * batch
    w = w_ref[...]                                          # one load, slice in vregs

    embed_bd = w[0:2 * EMB, _C_EMB:_C_PRO]                  # (20, 42) [[E,0],[0,E]]
    w_pro = w[0:2 * HID, _C_PRO:_C_GI]                      # (42, 84)
    b_pro = w[BIAS_ROW:, _C_PRO:_C_GI]                      # (1, 84)
    w_gi = w[0:HID, _C_GI:_C_GH]                            # (21, 63)
    b_gi = w[BIAS_ROW:, _C_GI:_C_GH]                        # (1, 63)  r/z biases combined
    w_gh = w[0:HID, _C_GH:_C_FC2]                           # (21, 63)
    b_gh = w[BIAS_ROW:, _C_GH:_C_FC2]                       # (1, 63)  only b_hn nonzero
    fc2w = w[0:HID, _C_FC2:_C_FC1]                          # (21, 21)
    fc2b = w[BIAS_ROW:, _C_FC2:_C_FC1]                      # (1, 21)
    fc1w = w[0:HID, _C_FC1:PACK_COLS]                       # (21, 10)
    fc1b = w[BIAS_ROW:, _C_FC1:PACK_COLS]                   # (1, 10)

    # ---- Prologue (non-recurrent, batched over all timesteps) --------------
    # In-kernel embedding lookup: one-hot over 20 lanes (x ids in 0:10, y ids
    # in 10:20) then a single MXU matmul against the block-diagonal table.
    ids = ids_ref[...]                                      # (SB, 2) int32
    lane = jax.lax.broadcasted_iota(jnp.int32, (sb, 2 * EMB), 1)
    tgt = jnp.where(lane < EMB, ids[:, 0:1], ids[:, 1:2] + EMB)
    onehot = (lane == tgt).astype(jnp.float32)              # (SB, 20)
    xy = jnp.dot(onehot, embed_bd,
                 preferred_element_type=jnp.float32)        # (SB, 42) = [x | y]

    # Fused gate matmul: cols 0:63 = x@W_ih + y@W_hh (+ b_ih+b_hh), gate order
    # r|z|n; cols 63:84 = y@W_hn (+ b_hn), kept separate (sits inside r*( )).
    gates = jnp.dot(xy, w_pro, preferred_element_type=jnp.float32) + b_pro
    rz = jax.nn.sigmoid(gates[:, :2 * HID])                 # one sigmoid for r and z
    r, zg = rz[:, :HID], rz[:, HID:2 * HID]
    ghn = gates[:, 3 * HID:4 * HID]                         # y@W_hn + b_hn
    n = jnp.tanh(gates[:, 2 * HID:3 * HID] + (r - 1.0) * ghn)
    y_emb = xy[:, HID:2 * HID]
    g_all = (1.0 - zg) * n + zg * y_emb                     # g_t = adder(x_t, y_t), all t

    # Hoisted input path of the recurrent GRU (off the serial chain).
    gi_all = jnp.dot(g_all, w_gi,
                     preferred_element_type=jnp.float32) + b_gi   # (SB, 63)

    # ---- Serial recurrence over time (the only dependent part), unrolled ---
    h = jnp.zeros((batch, HID), jnp.float32)
    h0_steps = []
    for t in range(seq_len):
        gi = gi_all[t * batch:(t + 1) * batch, :]           # static sublane slice
        gh = jnp.dot(h, w_gh, preferred_element_type=jnp.float32) + b_gh
        rz_t = jax.nn.sigmoid(gi[:, :2 * HID] + gh[:, :2 * HID])
        r_t, z_t = rz_t[:, :HID], rz_t[:, HID:2 * HID]
        n_t = jnp.tanh(gi[:, 2 * HID:3 * HID] + r_t * gh[:, 2 * HID:3 * HID])
        h0 = (1.0 - z_t) * n_t + z_t * h                    # h0 = adder(g_t, h)
        h0_steps.append(h0)                                 # stays in vregs
        h = jnp.maximum(                                    # h = relu(fc2(h0))
            jnp.dot(h0, fc2w, preferred_element_type=jnp.float32) + fc2b, 0.0)

    # ---- Epilogue: deferred fc1 as one batched matmul, single slab store ---
    h0_all = jnp.concatenate(h0_steps, axis=0)              # (SB, HID)
    z_ref[...] = jnp.dot(h0_all, fc1w,
                         preferred_element_type=jnp.float32) + fc1b


def _pack_weights(params):
    """Pack all weights/biases into one (43, 283) f32 buffer (one DMA)."""
    f32 = jnp.float32
    embed = params["embed"].astype(f32)                     # (10, 21)
    w_ih = params["gru_w_ih"].astype(f32).T                 # (21, 63) gate order r|z|n
    w_hh = params["gru_w_hh"].astype(f32).T                 # (21, 63)
    b_ih = params["gru_b_ih"].astype(f32)                   # (63,)
    b_hh = params["gru_b_hh"].astype(f32)                   # (63,)
    fc1w = params["fc1_w"].astype(f32).T                    # (21, 10)
    fc1b = params["fc1_b"].astype(f32)                      # (10,)
    fc2w = params["fc2_w"].astype(f32).T                    # (21, 21)
    fc2b = params["fc2_b"].astype(f32)                      # (21,)

    zero_e = jnp.zeros((EMB, HID), f32)
    embed_bd = jnp.concatenate([
        jnp.concatenate([embed, zero_e], axis=1),
        jnp.concatenate([zero_e, embed], axis=1)], axis=0)          # (20, 42)

    # Prologue fused gate weights: [x|y] @ w_pro.
    w_pro = jnp.concatenate([
        jnp.concatenate([w_ih, jnp.zeros((HID, HID), f32)], axis=1),
        jnp.concatenate([w_hh, w_hh[:, 2 * HID:]], axis=1)], axis=0)  # (42, 84)
    b_pro = jnp.concatenate([b_ih + b_hh, b_hh[2 * HID:]])            # (84,)

    # Recurrent GRU: r/z biases are purely additive -> pre-combined onto the
    # hoisted input path; only b_hn stays on the hidden path (inside r*( )).
    b_gi = jnp.concatenate([b_ih[:2 * HID] + b_hh[:2 * HID], b_ih[2 * HID:]])
    b_gh = jnp.concatenate([jnp.zeros((2 * HID,), f32), b_hh[2 * HID:]])

    def band(wmat, bias=None):
        cols = wmat.shape[1]
        wmat = jnp.pad(wmat, ((0, (PACK_ROWS - 1) - wmat.shape[0]), (0, 0)))
        bias = jnp.zeros((cols,), f32) if bias is None else bias
        return jnp.concatenate([wmat, bias[None, :]], axis=0)        # (43, cols)

    return jnp.concatenate([
        band(embed_bd),                 # cols 0:42
        band(w_pro, b_pro),             # cols 42:126
        band(w_ih, b_gi),               # cols 126:189
        band(w_hh, b_gh),               # cols 189:252
        band(fc2w, fc2b),               # cols 252:273
        band(fc1w, fc1b)], axis=1)      # cols 273:283   -> (43, 283)


def adv_rnn_forward(x0, y0, params):
    """Pallas implementation of myAdvPTRNNModel.forward.

    x0, y0: int32 (seq_len, batch) digit indices in [0, 10).
    Returns z_pred: float32 (seq_len, batch, 10).
    """
    seq_len, batch = x0.shape
    sb = seq_len * batch

    # Two inputs only: packed ids (one int32 array) and packed weights.
    ids = jnp.stack([x0.reshape(sb), y0.reshape(sb)], axis=1).astype(jnp.int32)
    wbuf = _pack_weights(params)

    vmem = pl.BlockSpec(memory_space=pltpu.MemorySpace.VMEM)
    z_flat = pl.pallas_call(
        functools.partial(_fused_rnn_kernel, seq_len, batch),
        out_shape=jax.ShapeDtypeStruct((sb, OUT), jnp.float32),
        in_specs=[vmem, vmem],
        out_specs=vmem,
    )(ids, wbuf)
    return z_flat.reshape(seq_len, batch, OUT)


def init_params(key):
    """Deterministic parameter init mirroring the module's layer shapes."""
    ks = jax.random.split(key, 9)
    u = lambda k, shape, scale: jax.random.uniform(
        k, shape, jnp.float32, minval=-scale, maxval=scale)
    embed = jax.random.normal(ks[0], (10, HID), jnp.float32)   # nn.Embedding(10, 21)
    s = 1.0 / jnp.sqrt(float(HID))
    fc1_w = u(ks[1], (OUT, HID), s)                            # nn.Linear(21, 10)
    fc1_b = u(ks[2], (OUT,), s)
    fc2_w = u(ks[3], (HID, HID), s)                            # nn.Linear(21, 21)
    fc2_b = u(ks[4], (HID,), s)
    gru_w_ih = u(ks[5], (3 * HID, HID), s)                     # nn.GRUCell(21, 21)
    gru_w_hh = u(ks[6], (3 * HID, HID), s)
    gru_b_ih = u(ks[7], (3 * HID,), s)
    gru_b_hh = u(ks[8], (3 * HID,), s)
    return dict(embed=embed, fc1_w=fc1_w, fc1_b=fc1_b, fc2_w=fc2_w, fc2_b=fc2_b,
                gru_w_ih=gru_w_ih, gru_w_hh=gru_w_hh,
                gru_b_ih=gru_b_ih, gru_b_hh=gru_b_hh)


def reference_forward(x0, y0, params):
    """Pure-JAX reference (mirrors the PyTorch forward) for correctness."""
    x = jnp.take(params["embed"], x0, axis=0)
    y = jnp.take(params["embed"], y0, axis=0)
    seq_len, batch = x0.shape

    def gru(inp, h):
        gi = inp @ params["gru_w_ih"].T + params["gru_b_ih"]
        gh = h @ params["gru_w_hh"].T + params["gru_b_hh"]
        r = jax.nn.sigmoid(gi[:, :HID] + gh[:, :HID])
        z = jax.nn.sigmoid(gi[:, HID:2 * HID] + gh[:, HID:2 * HID])
        n = jnp.tanh(gi[:, 2 * HID:] + r * gh[:, 2 * HID:])
        return (1.0 - z) * n + z * h

    h = jnp.zeros((batch, HID), jnp.float32)
    outs = []
    for i in range(seq_len):
        g = gru(x[i], y[i])
        h0 = gru(g, h)
        outs.append(h0 @ params["fc1_w"].T + params["fc1_b"])
        h = jax.nn.relu(h0 @ params["fc2_w"].T + params["fc2_b"])
    return jnp.stack(outs, axis=0)


if __name__ == "__main__":
    key = jax.random.PRNGKey(0)
    pkey, xkey, ykey = jax.random.split(key, 3)
    params = init_params(pkey)

    seq_len, batch = 8, 8
    x0 = jax.random.randint(xkey, (seq_len, batch), 0, 10, dtype=jnp.int32)
    y0 = jax.random.randint(ykey, (seq_len, batch), 0, 10, dtype=jnp.int32)

    fwd = jax.jit(adv_rnn_forward)           # single dispatch: wrapper prep + kernel
    z_pred = jax.block_until_ready(fwd(x0, y0, params))
    z_ref = reference_forward(x0, y0, params)

    assert z_pred.shape == (seq_len, batch, OUT)
    max_err = float(jnp.max(jnp.abs(z_pred - z_ref)))
    assert jnp.allclose(z_pred, z_ref, atol=1e-3, rtol=1e-3), max_err

    print("KERNEL_OK")
</pallas_src>

<mosaic_0001>
module attributes {stable_mosaic.version = 11 : i64} {
  func.func @_fused_rnn_kernel(%arg0: memref<64x2xi32, #tpu.memory_space<vmem>>, %arg1: memref<43x283xf32, #tpu.memory_space<vmem>>, %arg2: memref<64x10xf32, #tpu.memory_space<vmem>>) attributes {dimension_semantics = [], scalar_prefetch = 0 : i64, scratch_operands = 0 : i64, tpu.core_type = #tpu.core_type<tc>} {
    %c0 = arith.constant 0 : index
    %c0_0 = arith.constant 0 : index
    %0 = vector.load %arg1[%c0, %c0_0] : memref<43x283xf32, #tpu.memory_space<vmem>>, vector<43x283xf32>
    %1 = vector.extract_strided_slice %0 {offsets = [0, 0], sizes = [20, 42], strides = [1, 1]} : vector<43x283xf32> to vector<20x42xf32>
    %2 = vector.extract_strided_slice %0 {offsets = [0, 42], sizes = [42, 84], strides = [1, 1]} : vector<43x283xf32> to vector<42x84xf32>
    %3 = vector.extract_strided_slice %0 {offsets = [42, 42], sizes = [1, 84], strides = [1, 1]} : vector<43x283xf32> to vector<1x84xf32>
    %4 = vector.extract_strided_slice %0 {offsets = [0, 126], sizes = [21, 63], strides = [1, 1]} : vector<43x283xf32> to vector<21x63xf32>
    %5 = vector.extract_strided_slice %0 {offsets = [42, 126], sizes = [1, 63], strides = [1, 1]} : vector<43x283xf32> to vector<1x63xf32>
    %6 = vector.extract_strided_slice %0 {offsets = [0, 189], sizes = [21, 63], strides = [1, 1]} : vector<43x283xf32> to vector<21x63xf32>
    %7 = vector.extract_strided_slice %0 {offsets = [42, 189], sizes = [1, 63], strides = [1, 1]} : vector<43x283xf32> to vector<1x63xf32>
    %8 = vector.extract_strided_slice %0 {offsets = [0, 252], sizes = [21, 21], strides = [1, 1]} : vector<43x283xf32> to vector<21x21xf32>
    %9 = vector.extract_strided_slice %0 {offsets = [42, 252], sizes = [1, 21], strides = [1, 1]} : vector<43x283xf32> to vector<1x21xf32>
    %10 = vector.extract_strided_slice %0 {offsets = [0, 273], sizes = [21, 10], strides = [1, 1]} : vector<43x283xf32> to vector<21x10xf32>
    %11 = vector.extract_strided_slice %0 {offsets = [42, 273], sizes = [1, 10], strides = [1, 1]} : vector<43x283xf32> to vector<1x10xf32>
    %c0_1 = arith.constant 0 : index
    %c0_2 = arith.constant 0 : index
    %12 = vector.load %arg0[%c0_1, %c0_2] : memref<64x2xi32, #tpu.memory_space<vmem>>, vector<64x2xi32>
    %13 = tpu.iota {dimensions = array<i32: 1>} : vector<64x20xi32>
    %c10_i32 = arith.constant 10 : i32
    %14 = vector.broadcast %c10_i32 : i32 to vector<64x20xi32>
    %15 = arith.cmpi slt, %13, %14 : vector<64x20xi32>
    %16 = vector.extract_strided_slice %12 {offsets = [0, 0], sizes = [64, 1], strides = [1, 1]} : vector<64x2xi32> to vector<64x1xi32>
    %17 = vector.extract_strided_slice %12 {offsets = [0, 1], sizes = [64, 1], strides = [1, 1]} : vector<64x2xi32> to vector<64x1xi32>
    %c10_i32_3 = arith.constant 10 : i32
    %18 = vector.broadcast %c10_i32_3 : i32 to vector<64x1xi32>
    %19 = arith.addi %17, %18 : vector<64x1xi32>
    %20 = vector.shape_cast %16 : vector<64x1xi32> to vector<64x1xi32>
    %21 = vector.broadcast %20 : vector<64x1xi32> to vector<64x20xi32>
    %22 = vector.shape_cast %19 : vector<64x1xi32> to vector<64x1xi32>
    %23 = vector.broadcast %22 : vector<64x1xi32> to vector<64x20xi32>
    %24 = arith.select %15, %21, %23 : vector<64x20xi1>, vector<64x20xi32>
    %25 = arith.cmpi eq, %13, %24 : vector<64x20xi32>
    %26 = arith.extui %25 : vector<64x20xi1> to vector<64x20xi32>
    %27 = arith.sitofp %26 : vector<64x20xi32> to vector<64x20xf32>
    %cst = arith.constant dense<0.000000e+00> : vector<64x42xf32>
    %28 = tpu.matmul %27, %1, %cst {dimension_numbers = #tpu.dot_dimension_numbers<[1], [0], [0], [1], [0, 0, 1, 1], [], []>} : vector<64x20xf32>, vector<20x42xf32>, vector<64x42xf32> -> vector<64x42xf32>
    %cst_4 = arith.constant dense<0.000000e+00> : vector<64x84xf32>
    %29 = tpu.matmul %28, %2, %cst_4 {dimension_numbers = #tpu.dot_dimension_numbers<[1], [0], [0], [1], [0, 0, 1, 1], [], []>} : vector<64x42xf32>, vector<42x84xf32>, vector<64x84xf32> -> vector<64x84xf32>
    %30 = vector.broadcast %3 : vector<1x84xf32> to vector<64x84xf32>
    %31 = arith.addf %29, %30 : vector<64x84xf32>
    %32 = vector.extract_strided_slice %31 {offsets = [0, 0], sizes = [64, 42], strides = [1, 1]} : vector<64x84xf32> to vector<64x42xf32>
    %33 = arith.negf %32 : vector<64x42xf32>
    %34 = math.exp %33 : vector<64x42xf32>
    %cst_5 = arith.constant 1.000000e+00 : f32
    %35 = vector.broadcast %cst_5 : f32 to vector<64x42xf32>
    %36 = arith.addf %35, %34 : vector<64x42xf32>
    %37 = arith.divf %35, %36 : vector<64x42xf32>
    %38 = vector.extract_strided_slice %37 {offsets = [0, 0], sizes = [64, 21], strides = [1, 1]} : vector<64x42xf32> to vector<64x21xf32>
    %39 = vector.extract_strided_slice %37 {offsets = [0, 21], sizes = [64, 21], strides = [1, 1]} : vector<64x42xf32> to vector<64x21xf32>
    %40 = vector.extract_strided_slice %31 {offsets = [0, 63], sizes = [64, 21], strides = [1, 1]} : vector<64x84xf32> to vector<64x21xf32>
    %41 = vector.extract_strided_slice %31 {offsets = [0, 42], sizes = [64, 21], strides = [1, 1]} : vector<64x84xf32> to vector<64x21xf32>
    %cst_6 = arith.constant 1.000000e+00 : f32
    %42 = vector.broadcast %cst_6 : f32 to vector<64x21xf32>
    %43 = arith.subf %38, %42 : vector<64x21xf32>
    %44 = arith.mulf %43, %40 : vector<64x21xf32>
    %45 = arith.addf %41, %44 : vector<64x21xf32>
    %46 = math.tanh %45 : vector<64x21xf32>
    %47 = vector.extract_strided_slice %28 {offsets = [0, 21], sizes = [64, 21], strides = [1, 1]} : vector<64x42xf32> to vector<64x21xf32>
    %cst_7 = arith.constant 1.000000e+00 : f32
    %48 = vector.broadcast %cst_7 : f32 to vector<64x21xf32>
    %49 = arith.subf %48, %39 : vector<64x21xf32>
    %50 = arith.mulf %49, %46 : vector<64x21xf32>
    %51 = arith.mulf %39, %47 : vector<64x21xf32>
    %52 = arith.addf %50, %51 : vector<64x21xf32>
    %cst_8 = arith.constant dense<0.000000e+00> : vector<64x63xf32>
    %53 = tpu.matmul %52, %4, %cst_8 {dimension_numbers = #tpu.dot_dimension_numbers<[1], [0], [0], [1], [0, 0, 1, 1], [], []>} : vector<64x21xf32>, vector<21x63xf32>, vector<64x63xf32> -> vector<64x63xf32>
    %54 = vector.broadcast %5 : vector<1x63xf32> to vector<64x63xf32>
    %55 = arith.addf %53, %54 : vector<64x63xf32>
    %cst_9 = arith.constant 0.000000e+00 : f32
    %56 = vector.broadcast %cst_9 : f32 to vector<8x21xf32>
    %57 = vector.extract_strided_slice %55 {offsets = [0, 0], sizes = [8, 63], strides = [1, 1]} : vector<64x63xf32> to vector<8x63xf32>
    %cst_10 = arith.constant dense<0.000000e+00> : vector<8x63xf32>
    %58 = tpu.matmul %56, %6, %cst_10 {dimension_numbers = #tpu.dot_dimension_numbers<[1], [0], [0], [1], [0, 0, 1, 1], [], []>} : vector<8x21xf32>, vector<21x63xf32>, vector<8x63xf32> -> vector<8x63xf32>
    %59 = vector.broadcast %7 : vector<1x63xf32> to vector<8x63xf32>
    %60 = arith.addf %58, %59 : vector<8x63xf32>
    %61 = vector.extract_strided_slice %57 {offsets = [0, 0], sizes = [8, 42], strides = [1, 1]} : vector<8x63xf32> to vector<8x42xf32>
    %62 = vector.extract_strided_slice %60 {offsets = [0, 0], sizes = [8, 42], strides = [1, 1]} : vector<8x63xf32> to vector<8x42xf32>
    %63 = arith.addf %61, %62 : vector<8x42xf32>
    %64 = arith.negf %63 : vector<8x42xf32>
    %65 = math.exp %64 : vector<8x42xf32>
    %cst_11 = arith.constant 1.000000e+00 : f32
    %66 = vector.broadcast %cst_11 : f32 to vector<8x42xf32>
    %67 = arith.addf %66, %65 : vector<8x42xf32>
    %68 = arith.divf %66, %67 : vector<8x42xf32>
    %69 = vector.extract_strided_slice %68 {offsets = [0, 0], sizes = [8, 21], strides = [1, 1]} : vector<8x42xf32> to vector<8x21xf32>
    %70 = vector.extract_strided_slice %68 {offsets = [0, 21], sizes = [8, 21], strides = [1, 1]} : vector<8x42xf32> to vector<8x21xf32>
    %71 = vector.extract_strided_slice %57 {offsets = [0, 42], sizes = [8, 21], strides = [1, 1]} : vector<8x63xf32> to vector<8x21xf32>
    %72 = vector.extract_strided_slice %60 {offsets = [0, 42], sizes = [8, 21], strides = [1, 1]} : vector<8x63xf32> to vector<8x21xf32>
    %73 = arith.mulf %69, %72 : vector<8x21xf32>
    %74 = arith.addf %71, %73 : vector<8x21xf32>
    %75 = math.tanh %74 : vector<8x21xf32>
    %cst_12 = arith.constant 1.000000e+00 : f32
    %76 = vector.broadcast %cst_12 : f32 to vector<8x21xf32>
    %77 = arith.subf %76, %70 : vector<8x21xf32>
    %78 = arith.mulf %77, %75 : vector<8x21xf32>
    %79 = arith.mulf %70, %56 : vector<8x21xf32>
    %80 = arith.addf %78, %79 : vector<8x21xf32>
    %cst_13 = arith.constant dense<0.000000e+00> : vector<8x21xf32>
    %81 = tpu.matmul %80, %8, %cst_13 {dimension_numbers = #tpu.dot_dimension_numbers<[1], [0], [0], [1], [0, 0, 1, 1], [], []>} : vector<8x21xf32>, vector<21x21xf32>, vector<8x21xf32> -> vector<8x21xf32>
    %82 = vector.broadcast %9 : vector<1x21xf32> to vector<8x21xf32>
    %83 = arith.addf %81, %82 : vector<8x21xf32>
    %cst_14 = arith.constant 0.000000e+00 : f32
    %84 = vector.broadcast %cst_14 : f32 to vector<8x21xf32>
    %85 = arith.maximumf %83, %84 : vector<8x21xf32>
    %86 = vector.extract_strided_slice %55 {offsets = [8, 0], sizes = [8, 63], strides = [1, 1]} : vector<64x63xf32> to vector<8x63xf32>
    %cst_15 = arith.constant dense<0.000000e+00> : vector<8x63xf32>
    %87 = tpu.matmul %85, %6, %cst_15 {dimension_numbers = #tpu.dot_dimension_numbers<[1], [0], [0], [1], [0, 0, 1, 1], [], []>} : vector<8x21xf32>, vector<21x63xf32>, vector<8x63xf32> -> vector<8x63xf32>
    %88 = vector.broadcast %7 : vector<1x63xf32> to vector<8x63xf32>
    %89 = arith.addf %87, %88 : vector<8x63xf32>
    %90 = vector.extract_strided_slice %86 {offsets = [0, 0], sizes = [8, 42], strides = [1, 1]} : vector<8x63xf32> to vector<8x42xf32>
    %91 = vector.extract_strided_slice %89 {offsets = [0, 0], sizes = [8, 42], strides = [1, 1]} : vector<8x63xf32> to vector<8x42xf32>
    %92 = arith.addf %90, %91 : vector<8x42xf32>
    %93 = arith.negf %92 : vector<8x42xf32>
    %94 = math.exp %93 : vector<8x42xf32>
    %cst_16 = arith.constant 1.000000e+00 : f32
    %95 = vector.broadcast %cst_16 : f32 to vector<8x42xf32>
    %96 = arith.addf %95, %94 : vector<8x42xf32>
    %97 = arith.divf %95, %96 : vector<8x42xf32>
    %98 = vector.extract_strided_slice %97 {offsets = [0, 0], sizes = [8, 21], strides = [1, 1]} : vector<8x42xf32> to vector<8x21xf32>
    %99 = vector.extract_strided_slice %97 {offsets = [0, 21], sizes = [8, 21], strides = [1, 1]} : vector<8x42xf32> to vector<8x21xf32>
    %100 = vector.extract_strided_slice %86 {offsets = [0, 42], sizes = [8, 21], strides = [1, 1]} : vector<8x63xf32> to vector<8x21xf32>
    %101 = vector.extract_strided_slice %89 {offsets = [0, 42], sizes = [8, 21], strides = [1, 1]} : vector<8x63xf32> to vector<8x21xf32>
    %102 = arith.mulf %98, %101 : vector<8x21xf32>
    %103 = arith.addf %100, %102 : vector<8x21xf32>
    %104 = math.tanh %103 : vector<8x21xf32>
    %cst_17 = arith.constant 1.000000e+00 : f32
    %105 = vector.broadcast %cst_17 : f32 to vector<8x21xf32>
    %106 = arith.subf %105, %99 : vector<8x21xf32>
    %107 = arith.mulf %106, %104 : vector<8x21xf32>
    %108 = arith.mulf %99, %85 : vector<8x21xf32>
    %109 = arith.addf %107, %108 : vector<8x21xf32>
    %cst_18 = arith.constant dense<0.000000e+00> : vector<8x21xf32>
    %110 = tpu.matmul %109, %8, %cst_18 {dimension_numbers = #tpu.dot_dimension_numbers<[1], [0], [0], [1], [0, 0, 1, 1], [], []>} : vector<8x21xf32>, vector<21x21xf32>, vector<8x21xf32> -> vector<8x21xf32>
    %111 = vector.broadcast %9 : vector<1x21xf32> to vector<8x21xf32>
    %112 = arith.addf %110, %111 : vector<8x21xf32>
    %cst_19 = arith.constant 0.000000e+00 : f32
    %113 = vector.broadcast %cst_19 : f32 to vector<8x21xf32>
    %114 = arith.maximumf %112, %113 : vector<8x21xf32>
    %115 = vector.extract_strided_slice %55 {offsets = [16, 0], sizes = [8, 63], strides = [1, 1]} : vector<64x63xf32> to vector<8x63xf32>
    %cst_20 = arith.constant dense<0.000000e+00> : vector<8x63xf32>
    %116 = tpu.matmul %114, %6, %cst_20 {dimension_numbers = #tpu.dot_dimension_numbers<[1], [0], [0], [1], [0, 0, 1, 1], [], []>} : vector<8x21xf32>, vector<21x63xf32>, vector<8x63xf32> -> vector<8x63xf32>
    %117 = vector.broadcast %7 : vector<1x63xf32> to vector<8x63xf32>
    %118 = arith.addf %116, %117 : vector<8x63xf32>
    %119 = vector.extract_strided_slice %115 {offsets = [0, 0], sizes = [8, 42], strides = [1, 1]} : vector<8x63xf32> to vector<8x42xf32>
    %120 = vector.extract_strided_slice %118 {offsets = [0, 0], sizes = [8, 42], strides = [1, 1]} : vector<8x63xf32> to vector<8x42xf32>
    %121 = arith.addf %119, %120 : vector<8x42xf32>
    %122 = arith.negf %121 : vector<8x42xf32>
    %123 = math.exp %122 : vector<8x42xf32>
    %cst_21 = arith.constant 1.000000e+00 : f32
    %124 = vector.broadcast %cst_21 : f32 to vector<8x42xf32>
    %125 = arith.addf %124, %123 : vector<8x42xf32>
    %126 = arith.divf %124, %125 : vector<8x42xf32>
    %127 = vector.extract_strided_slice %126 {offsets = [0, 0], sizes = [8, 21], strides = [1, 1]} : vector<8x42xf32> to vector<8x21xf32>
    %128 = vector.extract_strided_slice %126 {offsets = [0, 21], sizes = [8, 21], strides = [1, 1]} : vector<8x42xf32> to vector<8x21xf32>
    %129 = vector.extract_strided_slice %115 {offsets = [0, 42], sizes = [8, 21], strides = [1, 1]} : vector<8x63xf32> to vector<8x21xf32>
    %130 = vector.extract_strided_slice %118 {offsets = [0, 42], sizes = [8, 21], strides = [1, 1]} : vector<8x63xf32> to vector<8x21xf32>
    %131 = arith.mulf %127, %130 : vector<8x21xf32>
    %132 = arith.addf %129, %131 : vector<8x21xf32>
    %133 = math.tanh %132 : vector<8x21xf32>
    %cst_22 = arith.constant 1.000000e+00 : f32
    %134 = vector.broadcast %cst_22 : f32 to vector<8x21xf32>
    %135 = arith.subf %134, %128 : vector<8x21xf32>
    %136 = arith.mulf %135, %133 : vector<8x21xf32>
    %137 = arith.mulf %128, %114 : vector<8x21xf32>
    %138 = arith.addf %136, %137 : vector<8x21xf32>
    %cst_23 = arith.constant dense<0.000000e+00> : vector<8x21xf32>
    %139 = tpu.matmul %138, %8, %cst_23 {dimension_numbers = #tpu.dot_dimension_numbers<[1], [0], [0], [1], [0, 0, 1, 1], [], []>} : vector<8x21xf32>, vector<21x21xf32>, vector<8x21xf32> -> vector<8x21xf32>
    %140 = vector.broadcast %9 : vector<1x21xf32> to vector<8x21xf32>
    %141 = arith.addf %139, %140 : vector<8x21xf32>
    %cst_24 = arith.constant 0.000000e+00 : f32
    %142 = vector.broadcast %cst_24 : f32 to vector<8x21xf32>
    %143 = arith.maximumf %141, %142 : vector<8x21xf32>
    %144 = vector.extract_strided_slice %55 {offsets = [24, 0], sizes = [8, 63], strides = [1, 1]} : vector<64x63xf32> to vector<8x63xf32>
    %cst_25 = arith.constant dense<0.000000e+00> : vector<8x63xf32>
    %145 = tpu.matmul %143, %6, %cst_25 {dimension_numbers = #tpu.dot_dimension_numbers<[1], [0], [0], [1], [0, 0, 1, 1], [], []>} : vector<8x21xf32>, vector<21x63xf32>, vector<8x63xf32> -> vector<8x63xf32>
    %146 = vector.broadcast %7 : vector<1x63xf32> to vector<8x63xf32>
    %147 = arith.addf %145, %146 : vector<8x63xf32>
    %148 = vector.extract_strided_slice %144 {offsets = [0, 0], sizes = [8, 42], strides = [1, 1]} : vector<8x63xf32> to vector<8x42xf32>
    %149 = vector.extract_strided_slice %147 {offsets = [0, 0], sizes = [8, 42], strides = [1, 1]} : vector<8x63xf32> to vector<8x42xf32>
    %150 = arith.addf %148, %149 : vector<8x42xf32>
    %151 = arith.negf %150 : vector<8x42xf32>
    %152 = math.exp %151 : vector<8x42xf32>
    %cst_26 = arith.constant 1.000000e+00 : f32
    %153 = vector.broadcast %cst_26 : f32 to vector<8x42xf32>
    %154 = arith.addf %153, %152 : vector<8x42xf32>
    %155 = arith.divf %153, %154 : vector<8x42xf32>
    %156 = vector.extract_strided_slice %155 {offsets = [0, 0], sizes = [8, 21], strides = [1, 1]} : vector<8x42xf32> to vector<8x21xf32>
    %157 = vector.extract_strided_slice %155 {offsets = [0, 21], sizes = [8, 21], strides = [1, 1]} : vector<8x42xf32> to vector<8x21xf32>
    %158 = vector.extract_strided_slice %144 {offsets = [0, 42], sizes = [8, 21], strides = [1, 1]} : vector<8x63xf32> to vector<8x21xf32>
    %159 = vector.extract_strided_slice %147 {offsets = [0, 42], sizes = [8, 21], strides = [1, 1]} : vector<8x63xf32> to vector<8x21xf32>
    %160 = arith.mulf %156, %159 : vector<8x21xf32>
    %161 = arith.addf %158, %160 : vector<8x21xf32>
    %162 = math.tanh %161 : vector<8x21xf32>
    %cst_27 = arith.constant 1.000000e+00 : f32
    %163 = vector.broadcast %cst_27 : f32 to vector<8x21xf32>
    %164 = arith.subf %163, %157 : vector<8x21xf32>
    %165 = arith.mulf %164, %162 : vector<8x21xf32>
    %166 = arith.mulf %157, %143 : vector<8x21xf32>
    %167 = arith.addf %165, %166 : vector<8x21xf32>
    %cst_28 = arith.constant dense<0.000000e+00> : vector<8x21xf32>
    %168 = tpu.matmul %167, %8, %cst_28 {dimension_numbers = #tpu.dot_dimension_numbers<[1], [0], [0], [1], [0, 0, 1, 1], [], []>} : vector<8x21xf32>, vector<21x21xf32>, vector<8x21xf32> -> vector<8x21xf32>
    %169 = vector.broadcast %9 : vector<1x21xf32> to vector<8x21xf32>
    %170 = arith.addf %168, %169 : vector<8x21xf32>
    %cst_29 = arith.constant 0.000000e+00 : f32
    %171 = vector.broadcast %cst_29 : f32 to vector<8x21xf32>
    %172 = arith.maximumf %170, %171 : vector<8x21xf32>
    %173 = vector.extract_strided_slice %55 {offsets = [32, 0], sizes = [8, 63], strides = [1, 1]} : vector<64x63xf32> to vector<8x63xf32>
    %cst_30 = arith.constant dense<0.000000e+00> : vector<8x63xf32>
    %174 = tpu.matmul %172, %6, %cst_30 {dimension_numbers = #tpu.dot_dimension_numbers<[1], [0], [0], [1], [0, 0, 1, 1], [], []>} : vector<8x21xf32>, vector<21x63xf32>, vector<8x63xf32> -> vector<8x63xf32>
    %175 = vector.broadcast %7 : vector<1x63xf32> to vector<8x63xf32>
    %176 = arith.addf %174, %175 : vector<8x63xf32>
    %177 = vector.extract_strided_slice %173 {offsets = [0, 0], sizes = [8, 42], strides = [1, 1]} : vector<8x63xf32> to vector<8x42xf32>
    %178 = vector.extract_strided_slice %176 {offsets = [0, 0], sizes = [8, 42], strides = [1, 1]} : vector<8x63xf32> to vector<8x42xf32>
    %179 = arith.addf %177, %178 : vector<8x42xf32>
    %180 = arith.negf %179 : vector<8x42xf32>
    %181 = math.exp %180 : vector<8x42xf32>
    %cst_31 = arith.constant 1.000000e+00 : f32
    %182 = vector.broadcast %cst_31 : f32 to vector<8x42xf32>
    %183 = arith.addf %182, %181 : vector<8x42xf32>
    %184 = arith.divf %182, %183 : vector<8x42xf32>
    %185 = vector.extract_strided_slice %184 {offsets = [0, 0], sizes = [8, 21], strides = [1, 1]} : vector<8x42xf32> to vector<8x21xf32>
    %186 = vector.extract_strided_slice %184 {offsets = [0, 21], sizes = [8, 21], strides = [1, 1]} : vector<8x42xf32> to vector<8x21xf32>
    %187 = vector.extract_strided_slice %173 {offsets = [0, 42], sizes = [8, 21], strides = [1, 1]} : vector<8x63xf32> to vector<8x21xf32>
    %188 = vector.extract_strided_slice %176 {offsets = [0, 42], sizes = [8, 21], strides = [1, 1]} : vector<8x63xf32> to vector<8x21xf32>
    %189 = arith.mulf %185, %188 : vector<8x21xf32>
    %190 = arith.addf %187, %189 : vector<8x21xf32>
    %191 = math.tanh %190 : vector<8x21xf32>
    %cst_32 = arith.constant 1.000000e+00 : f32
    %192 = vector.broadcast %cst_32 : f32 to vector<8x21xf32>
    %193 = arith.subf %192, %186 : vector<8x21xf32>
    %194 = arith.mulf %193, %191 : vector<8x21xf32>
    %195 = arith.mulf %186, %172 : vector<8x21xf32>
    %196 = arith.addf %194, %195 : vector<8x21xf32>
    %cst_33 = arith.constant dense<0.000000e+00> : vector<8x21xf32>
    %197 = tpu.matmul %196, %8, %cst_33 {dimension_numbers = #tpu.dot_dimension_numbers<[1], [0], [0], [1], [0, 0, 1, 1], [], []>} : vector<8x21xf32>, vector<21x21xf32>, vector<8x21xf32> -> vector<8x21xf32>
    %198 = vector.broadcast %9 : vector<1x21xf32> to vector<8x21xf32>
    %199 = arith.addf %197, %198 : vector<8x21xf32>
    %cst_34 = arith.constant 0.000000e+00 : f32
    %200 = vector.broadcast %cst_34 : f32 to vector<8x21xf32>
    %201 = arith.maximumf %199, %200 : vector<8x21xf32>
    %202 = vector.extract_strided_slice %55 {offsets = [40, 0], sizes = [8, 63], strides = [1, 1]} : vector<64x63xf32> to vector<8x63xf32>
    %cst_35 = arith.constant dense<0.000000e+00> : vector<8x63xf32>
    %203 = tpu.matmul %201, %6, %cst_35 {dimension_numbers = #tpu.dot_dimension_numbers<[1], [0], [0], [1], [0, 0, 1, 1], [], []>} : vector<8x21xf32>, vector<21x63xf32>, vector<8x63xf32> -> vector<8x63xf32>
    %204 = vector.broadcast %7 : vector<1x63xf32> to vector<8x63xf32>
    %205 = arith.addf %203, %204 : vector<8x63xf32>
    %206 = vector.extract_strided_slice %202 {offsets = [0, 0], sizes = [8, 42], strides = [1, 1]} : vector<8x63xf32> to vector<8x42xf32>
    %207 = vector.extract_strided_slice %205 {offsets = [0, 0], sizes = [8, 42], strides = [1, 1]} : vector<8x63xf32> to vector<8x42xf32>
    %208 = arith.addf %206, %207 : vector<8x42xf32>
    %209 = arith.negf %208 : vector<8x42xf32>
    %210 = math.exp %209 : vector<8x42xf32>
    %cst_36 = arith.constant 1.000000e+00 : f32
    %211 = vector.broadcast %cst_36 : f32 to vector<8x42xf32>
    %212 = arith.addf %211, %210 : vector<8x42xf32>
    %213 = arith.divf %211, %212 : vector<8x42xf32>
    %214 = vector.extract_strided_slice %213 {offsets = [0, 0], sizes = [8, 21], strides = [1, 1]} : vector<8x42xf32> to vector<8x21xf32>
    %215 = vector.extract_strided_slice %213 {offsets = [0, 21], sizes = [8, 21], strides = [1, 1]} : vector<8x42xf32> to vector<8x21xf32>
    %216 = vector.extract_strided_slice %202 {offsets = [0, 42], sizes = [8, 21], strides = [1, 1]} : vector<8x63xf32> to vector<8x21xf32>
    %217 = vector.extract_strided_slice %205 {offsets = [0, 42], sizes = [8, 21], strides = [1, 1]} : vector<8x63xf32> to vector<8x21xf32>
    %218 = arith.mulf %214, %217 : vector<8x21xf32>
    %219 = arith.addf %216, %218 : vector<8x21xf32>
    %220 = math.tanh %219 : vector<8x21xf32>
    %cst_37 = arith.constant 1.000000e+00 : f32
    %221 = vector.broadcast %cst_37 : f32 to vector<8x21xf32>
    %222 = arith.subf %221, %215 : vector<8x21xf32>
    %223 = arith.mulf %222, %220 : vector<8x21xf32>
    %224 = arith.mulf %215, %201 : vector<8x21xf32>
    %225 = arith.addf %223, %224 : vector<8x21xf32>
    %cst_38 = arith.constant dense<0.000000e+00> : vector<8x21xf32>
    %226 = tpu.matmul %225, %8, %cst_38 {dimension_numbers = #tpu.dot_dimension_numbers<[1], [0], [0], [1], [0, 0, 1, 1], [], []>} : vector<8x21xf32>, vector<21x21xf32>, vector<8x21xf32> -> vector<8x21xf32>
    %227 = vector.broadcast %9 : vector<1x21xf32> to vector<8x21xf32>
    %228 = arith.addf %226, %227 : vector<8x21xf32>
    %cst_39 = arith.constant 0.000000e+00 : f32
    %229 = vector.broadcast %cst_39 : f32 to vector<8x21xf32>
    %230 = arith.maximumf %228, %229 : vector<8x21xf32>
    %231 = vector.extract_strided_slice %55 {offsets = [48, 0], sizes = [8, 63], strides = [1, 1]} : vector<64x63xf32> to vector<8x63xf32>
    %cst_40 = arith.constant dense<0.000000e+00> : vector<8x63xf32>
    %232 = tpu.matmul %230, %6, %cst_40 {dimension_numbers = #tpu.dot_dimension_numbers<[1], [0], [0], [1], [0, 0, 1, 1], [], []>} : vector<8x21xf32>, vector<21x63xf32>, vector<8x63xf32> -> vector<8x63xf32>
    %233 = vector.broadcast %7 : vector<1x63xf32> to vector<8x63xf32>
    %234 = arith.addf %232, %233 : vector<8x63xf32>
    %235 = vector.extract_strided_slice %231 {offsets = [0, 0], sizes = [8, 42], strides = [1, 1]} : vector<8x63xf32> to vector<8x42xf32>
    %236 = vector.extract_strided_slice %234 {offsets = [0, 0], sizes = [8, 42], strides = [1, 1]} : vector<8x63xf32> to vector<8x42xf32>
    %237 = arith.addf %235, %236 : vector<8x42xf32>
    %238 = arith.negf %237 : vector<8x42xf32>
    %239 = math.exp %238 : vector<8x42xf32>
    %cst_41 = arith.constant 1.000000e+00 : f32
    %240 = vector.broadcast %cst_41 : f32 to vector<8x42xf32>
    %241 = arith.addf %240, %239 : vector<8x42xf32>
    %242 = arith.divf %240, %241 : vector<8x42xf32>
    %243 = vector.extract_strided_slice %242 {offsets = [0, 0], sizes = [8, 21], strides = [1, 1]} : vector<8x42xf32> to vector<8x21xf32>
    %244 = vector.extract_strided_slice %242 {offsets = [0, 21], sizes = [8, 21], strides = [1, 1]} : vector<8x42xf32> to vector<8x21xf32>
    %245 = vector.extract_strided_slice %231 {offsets = [0, 42], sizes = [8, 21], strides = [1, 1]} : vector<8x63xf32> to vector<8x21xf32>
    %246 = vector.extract_strided_slice %234 {offsets = [0, 42], sizes = [8, 21], strides = [1, 1]} : vector<8x63xf32> to vector<8x21xf32>
    %247 = arith.mulf %243, %246 : vector<8x21xf32>
    %248 = arith.addf %245, %247 : vector<8x21xf32>
    %249 = math.tanh %248 : vector<8x21xf32>
    %cst_42 = arith.constant 1.000000e+00 : f32
    %250 = vector.broadcast %cst_42 : f32 to vector<8x21xf32>
    %251 = arith.subf %250, %244 : vector<8x21xf32>
    %252 = arith.mulf %251, %249 : vector<8x21xf32>
    %253 = arith.mulf %244, %230 : vector<8x21xf32>
    %254 = arith.addf %252, %253 : vector<8x21xf32>
    %cst_43 = arith.constant dense<0.000000e+00> : vector<8x21xf32>
    %255 = tpu.matmul %254, %8, %cst_43 {dimension_numbers = #tpu.dot_dimension_numbers<[1], [0], [0], [1], [0, 0, 1, 1], [], []>} : vector<8x21xf32>, vector<21x21xf32>, vector<8x21xf32> -> vector<8x21xf32>
    %256 = vector.broadcast %9 : vector<1x21xf32> to vector<8x21xf32>
    %257 = arith.addf %255, %256 : vector<8x21xf32>
    %cst_44 = arith.constant 0.000000e+00 : f32
    %258 = vector.broadcast %cst_44 : f32 to vector<8x21xf32>
    %259 = arith.maximumf %257, %258 : vector<8x21xf32>
    %260 = vector.extract_strided_slice %55 {offsets = [56, 0], sizes = [8, 63], strides = [1, 1]} : vector<64x63xf32> to vector<8x63xf32>
    %cst_45 = arith.constant dense<0.000000e+00> : vector<8x63xf32>
    %261 = tpu.matmul %259, %6, %cst_45 {dimension_numbers = #tpu.dot_dimension_numbers<[1], [0], [0], [1], [0, 0, 1, 1], [], []>} : vector<8x21xf32>, vector<21x63xf32>, vector<8x63xf32> -> vector<8x63xf32>
    %262 = vector.broadcast %7 : vector<1x63xf32> to vector<8x63xf32>
    %263 = arith.addf %261, %262 : vector<8x63xf32>
    %264 = vector.extract_strided_slice %260 {offsets = [0, 0], sizes = [8, 42], strides = [1, 1]} : vector<8x63xf32> to vector<8x42xf32>
    %265 = vector.extract_strided_slice %263 {offsets = [0, 0], sizes = [8, 42], strides = [1, 1]} : vector<8x63xf32> to vector<8x42xf32>
    %266 = arith.addf %264, %265 : vector<8x42xf32>
    %267 = arith.negf %266 : vector<8x42xf32>
    %268 = math.exp %267 : vector<8x42xf32>
    %cst_46 = arith.constant 1.000000e+00 : f32
    %269 = vector.broadcast %cst_46 : f32 to vector<8x42xf32>
    %270 = arith.addf %269, %268 : vector<8x42xf32>
    %271 = arith.divf %269, %270 : vector<8x42xf32>
    %272 = vector.extract_strided_slice %271 {offsets = [0, 0], sizes = [8, 21], strides = [1, 1]} : vector<8x42xf32> to vector<8x21xf32>
    %273 = vector.extract_strided_slice %271 {offsets = [0, 21], sizes = [8, 21], strides = [1, 1]} : vector<8x42xf32> to vector<8x21xf32>
    %274 = vector.extract_strided_slice %260 {offsets = [0, 42], sizes = [8, 21], strides = [1, 1]} : vector<8x63xf32> to vector<8x21xf32>
    %275 = vector.extract_strided_slice %263 {offsets = [0, 42], sizes = [8, 21], strides = [1, 1]} : vector<8x63xf32> to vector<8x21xf32>
    %276 = arith.mulf %272, %275 : vector<8x21xf32>
    %277 = arith.addf %274, %276 : vector<8x21xf32>
    %278 = math.tanh %277 : vector<8x21xf32>
    %cst_47 = arith.constant 1.000000e+00 : f32
    %279 = vector.broadcast %cst_47 : f32 to vector<8x21xf32>
    %280 = arith.subf %279, %273 : vector<8x21xf32>
    %281 = arith.mulf %280, %278 : vector<8x21xf32>
    %282 = arith.mulf %273, %259 : vector<8x21xf32>
    %283 = arith.addf %281, %282 : vector<8x21xf32>
    %284 = tpu.concatenate %80, %109, %138, %167, %196, %225, %254, %283 in 0 : vector<8x21xf32>, vector<8x21xf32>, vector<8x21xf32>, vector<8x21xf32>, vector<8x21xf32>, vector<8x21xf32>, vector<8x21xf32>, vector<8x21xf32> -> vector<64x21xf32>
    %cst_48 = arith.constant dense<0.000000e+00> : vector<64x10xf32>
    %285 = tpu.matmul %284, %10, %cst_48 {dimension_numbers = #tpu.dot_dimension_numbers<[1], [0], [0], [1], [0, 0, 1, 1], [], []>} : vector<64x21xf32>, vector<21x10xf32>, vector<64x10xf32> -> vector<64x10xf32>
    %286 = vector.broadcast %11 : vector<1x10xf32> to vector<64x10xf32>
    %287 = arith.addf %285, %286 : vector<64x10xf32>
    %c0_49 = arith.constant 0 : index
    %c0_50 = arith.constant 0 : index
    %288 = vector.load %arg2[%c0_49, %c0_50] : memref<64x10xf32, #tpu.memory_space<vmem>>, vector<64x10xf32>
    tpu.vector_store %arg2[%c0_49, %c0_50], %287 {strides = array<i32>} : memref<64x10xf32, #tpu.memory_space<vmem>>, vector<64x10xf32>,
    return
  }
}

</mosaic_0001>

<bundles_post_ra>
// kernel: adv_rnn_forward.1
= control target key start
LH: loop header
LB: loop body
LE: loop exit
PB: predicated region body
PF: predicated region fallthrough
CT: control target
= control target key end

     0   :  { %v3033_v2 = vmov 0   ;;  %s3707_s0 = inlined_call_operand.vmem [shape: s32[64,2], index: 0, kind: input, shape index: {}]   ;;  %s3708_s1 = inlined_call_operand.vmem [shape: f32[43,283], index: 1, kind: input, shape index: {}]   ;;  %s3709_s2 = inlined_call_operand.hbm [shape: f32[64,10], index: 2, kind: output, shape index: {}]  }
   0x1   :  { %v27_v0 = vld [vmem:[%s3707_s0 + $0x8] sm:$0xff]  ;;  %v26_v1 = vld [vmem:[%s3707_s0] sm:$0xff]  ;;  %2865 = vset.pattern.permute.xlu1 %v3033_v2  ;;  %2863 = vset.pattern.permute.xlu0 %v3033_v2  ;;  %v3080_v6 = vld [vmem:[%s3708_s1 + $0x18] sm:$0xff] }
   0x2   :  { %49 = vperm.xlu1 %2865, %v27_v0   ;;  %46 = vperm.xlu0 %2863, %v26_v1   ;;  %v3075_v3 = vld [vmem:[%s3708_s1] sm:$0xff]  ;;  %v38_v4 = vadd.s32 10, %v27_v0  ;;  %v37_v5 = vadd.s32 10, %v26_v1 }
   0x3   :  { %7 = vsyncpa [#allocation3], 0  ;;  %v28_v7 = vld [vmem:[%s3707_s0 + $0x10] sm:$0xff]  ;;  %v2768_v8 = vpack.c.bf16 %v3080_v6, %v3075_v3  ;;  %v3034_v9 = vmov 1   ;;  %v29_v11 = vld [vmem:[%s3707_s0 + $0x18] sm:$0xff]  ;;  %vm150_vm0 = vcmask 1043456   ;;  %v2868_v22 = vpack.i.bf16 %v3080_v6, %v3075_v3 }
   0x4   :  { %v39_v10 = vadd.s32 10, %v28_v7  ;;  %v3093_v12 = vld [vmem:[%s3708_s1 + $0x30] sm:$0xff]  ;;  %v40_v13 = vadd.s32 10, %v29_v11  ;;  %v30_v14 = vld [vmem:[%s3707_s0 + $0x20] sm:$0xff]  ;;  %v31_v16 = vld [vmem:[%s3707_s0 + $0x28] sm:$0xff]  ;;  %v34_v28 = vlaneseq  ;;  %vm125_vm2 = vcmask 162816  }
   0x5   :  { %2769 = vmatprep.subr.bf16.mxu0 %v2768_v8  ;;  %v41_v15 = vadd.s32 10, %v30_v14  ;;  %v42_v17 = vadd.s32 10, %v31_v16  ;;  %v32_v18 = vld [vmem:[%s3707_s0 + $0x30] sm:$0xff]  ;;  %v33_v20 = vld [vmem:[%s3707_s0 + $0x38] sm:$0xff]  ;;  %v21_v23 = vld [vmem:[%s3708_s1 + $0x48] sm:$0xff]  ;;  %s3035_s0 = smov 86  }
   0x6   :  { %2866 = vset.pattern.permute.xlu1 %v3034_v9  ;;  %2864 = vset.pattern.permute.xlu0 %v3034_v9  ;;  %v43_v19 = vadd.s32 10, %v32_v18  ;;  %v44_v21 = vadd.s32 10, %v33_v20  ;;  %v22_v24 = vld [vmem:[%s3708_s1 + $0x60] sm:$0xff]  ;;  %v3120_v25 = vld [vmem:[%s3708_s1 + $0x78] sm:$0x7]  ;;  %v2873_v26 = vpack.i.bf16 %v21_v23, %v3093_v12  ;;  %v35_v29 = vand.u32 127, %v34_v28 }
   0x7   :  { %73 = vperm.xlu1 %2866, %v38_v4   ;;  %70 = vperm.xlu0 %2864, %v37_v5   ;;  %v2878_v27 = vpack.i.bf16 %v3120_v25, %v22_v24  ;;  %v3036_v36 = vmov 0.0   ;;  %vm314_vm11 = vcmask 1041408   ;;  %vm3037_vm12 = vmmov 1   ;;  %s3038_s9 = smov 65   ;;  %s3039_s10 = smov 42  }
   0x8   :  { %2771 = vmatpush3.bf16.msra.mxu0 %v2768_v8  ;;  %vm36_vm1 = vcmp.lt.s32.totalorder %v35_v29, 10  ;;  %vm2781_vm13 = vmpackc.low %vm314_vm11, %vm3037_vm12  ;;  %vm289_vm14 = vcmask 343040   ;;  %s3041_s15 = smov 107   ;;  %vm3042_vm15 = vmmov 0   ;;  %s3043_s18 = smov 67  }
   0x9   :  { %2559 = vmatprep.subr.msk.mxu0 %vm150_vm0, %v3093_v12  ;;  %s3044_s19 = smov 2   ;;  %s3045_s26 = smov 4  }
   0xa   :  { %s3047_s3 = smov 111   ;;  %s3048_s4 = smov [#allocation2]  }
   0xb   :  { %2867 = vset.pattern.permute.xlu1 %v3033_v2  ;;  %76 = vperm.xlu0 %2864, %v39_v10   ;;  %s2340_s5 = sshll.u32 %s3048_s4, 4  ;;  %s2341_s5 = int_to_ptr.vmem [resolvable:$true] %s2340_s5 }
   0xc   :  { %52 = vperm.xlu1 %2867, %v28_v7   ;;  %2560 = vmatpush3.msk.msra.mxu0 %vm150_vm0, %v3093_v12  ;;  %vm673_vm0 = vcmask 15360   ;;  %s3009_s6 = scalar_lea.vmem %s2341_s5, 1024  ;;  %p3014_p1 = scmp.lt.s32.totalorder %s2341_s5, %s2341_s5 }
   0xd   :  { %p3010_p0 = scmp.ne.s32.totalorder %s2341_s5, %s3009_s6  ;;  %p3015_p2 = scmp.lt.s32.totalorder %s3009_s6, %s3009_s6 }
   0xf   :  { %79 = vperm.xlu0 %2864, %v40_v13   ;;  %p3016_p3 = por %p3015_p2, %p3014_p1 }
  0x10   :  { %55 = vperm.xlu1 %2867, %v29_v11  }
  0x11   :  { %p3017_p4 = pnand %p3016_p3, %p3010_p0 }
  0x13   :  { %82 = vperm.xlu0 %2864, %v41_v15  }
  0x14   :  { %58 = vperm.xlu1 %2867, %v30_v14   ;;  %v260_v14 = vshrl.u32 %v34_v28, 7 }
  0x16   :  { %v3153_v15 = vsub.s32 2, %v260_v14 }
  0x17   :  { %85 = vperm.xlu0 %2864, %v42_v17  }
  0x18   :  { %61 = vperm.xlu1 %2867, %v31_v16   ;;  %v3157_v16 = vrot.slane %v3120_v25, %v3153_v15 }
  0x1b   :  { %88 = vperm.xlu0 %2864, %v43_v19  }
  0x1c   :  { %64 = vperm.xlu1 %2867, %v32_v18  }
  0x1f   :  { %91 = vperm.xlu0 %2864, %v44_v21  }
  0x20   :  { %67 = vperm.xlu1 %2867, %v33_v20  }
  0x23   :  { %2874 = vrot.lane.b32.xlu0 %v2873_v26, %s3035_s0 }
  0x24   :  { %2869 = vrot.lane.b32.xlu1 %v2868_v22, %s3035_s0 }
  0x27   :  { %286 = vrot.lane.b32.xlu0 %v3157_v16, %s3035_s0 }
  0x28   :  { %2879 = vrot.lane.b32.xlu1 %v2878_v27, %s3035_s0 }
  0x81   :  { %v47_v30 = vpop.permute.xlu0 %46  ;;  %v50_v31 = vpop.permute.xlu1 %49 }
  0x86   :  { %v74_v32 = vpop.permute.xlu1 %73  ;;  %v71_v33 = vpop.permute.xlu0 %70 }
  0x87   :  { %v94_v34 = vsel %vm36_vm1, %v50_v31, %v74_v32  ;;  %v93_v35 = vsel %vm36_vm1, %v47_v30, %v71_v33 }
  0x88   :  { %vm102_vm3 = vcmp.eq.s32.totalorder %v35_v29, %v94_v34  ;;  %vm101_vm4 = vcmp.eq.s32.totalorder %v35_v29, %v93_v35 }
  0x89   :  { %v2351_v37 = vsel %vm101_vm4, 1.0, %v3036_v36  ;;  %v2352_v38 = vsel %vm102_vm3, 1.0, %v3036_v36  ;;  %vm945_vm3 = vcmask 31744   ;;  %vm2326_vm4 = vcmask 80896  }
  0x8a   :  { %2561 = vmatprep.mubr.msk.f32.mxu0 %vm125_vm2, %v2351_v37  ;;  %v77_v39 = vpop.permute.xlu0 %76 }
  0x8b   :  { %v53_v40 = vpop.permute.xlu1 %52  ;;  %2562 = vmatmul.mubr.msk.f32.vlgmr.msra.gmra.mrb[0].mxu0 %vm125_vm2, %v2352_v38 }
  0x8c   :  { %v95_v41 = vsel %vm36_vm1, %v53_v40, %v77_v39 }
  0x8d   :  { %vm103_vm5 = vcmp.eq.s32.totalorder %v35_v29, %v95_v41 }
  0x8e   :  { %v80_v42 = vpop.permute.xlu0 %79  ;;  %v2353_v43 = vsel %vm103_vm5, 1.0, %v3036_v36 }
  0x8f   :  { %v56_v44 = vpop.permute.xlu1 %55  ;;  %2564 = vmatprep.mubr.msk.f32.mxu0 %vm125_vm2, %v2353_v43 }
  0x90   :  { %v96_v45 = vsel %vm36_vm1, %v56_v44, %v80_v42 }
  0x91   :  { %vm104_vm6 = vcmp.eq.s32.totalorder %v35_v29, %v96_v45 }
  0x92   :  { %v83_v46 = vpop.permute.xlu0 %82  ;;  %v2354_v47 = vsel %vm104_vm6, 1.0, %v3036_v36 }
  0x93   :  { %v59_v48 = vpop.permute.xlu1 %58  ;;  %2565 = vmatmul.mubr.msk.f32.gmra.mrb[2].mxu0 %vm125_vm2, %v2354_v47 }
  0x94   :  { %v97_v49 = vsel %vm36_vm1, %v59_v48, %v83_v46 }
  0x95   :  { %vm105_vm7 = vcmp.eq.s32.totalorder %v35_v29, %v97_v49 }
  0x96   :  { %v86_v50 = vpop.permute.xlu0 %85  ;;  %v2355_v51 = vsel %vm105_vm7, 1.0, %v3036_v36 }
  0x97   :  { %v62_v52 = vpop.permute.xlu1 %61  ;;  %2567 = vmatprep.mubr.msk.f32.mxu0 %vm125_vm2, %v2355_v51 }
  0x98   :  { %v98_v53 = vsel %vm36_vm1, %v62_v52, %v86_v50 }
  0x99   :  { %vm106_vm8 = vcmp.eq.s32.totalorder %v35_v29, %v98_v53 }
  0x9a   :  { %v89_v54 = vpop.permute.xlu0 %88  ;;  %v2356_v55 = vsel %vm106_vm8, 1.0, %v3036_v36 }
  0x9b   :  { %v65_v56 = vpop.permute.xlu1 %64  ;;  %2568 = vmatmul.mubr.msk.f32.gmra.mrb[4].mxu0 %vm125_vm2, %v2356_v55 }
  0x9c   :  { %v99_v57 = vsel %vm36_vm1, %v65_v56, %v89_v54 }
  0x9d   :  { %vm107_vm9 = vcmp.eq.s32.totalorder %v35_v29, %v99_v57 }
  0x9e   :  { %v92_v58 = vpop.permute.xlu0 %91  ;;  %v2357_v59 = vsel %vm107_vm9, 1.0, %v3036_v36 }
  0x9f   :  { %v68_v60 = vpop.permute.xlu1 %67  ;;  %2570 = vmatprep.mubr.msk.f32.mxu0 %vm125_vm2, %v2357_v59 }
  0xa0   :  { %v100_v61 = vsel %vm36_vm1, %v68_v60, %v92_v58  ;;  %vm703_vm1 = vcmask 1044480  }
  0xa1   :  { %vm108_vm10 = vcmp.eq.s32.totalorder %v35_v29, %v100_v61 }
  0xa2   :  { %v2358_v62 = vsel %vm108_vm10, 1.0, %v3036_v36  ;;  %v2875_v63 = vpop.permute.xlu0 %2874 }
  0xa3   :  { %2571 = vmatmul.mubr.msk.f32.gmra.mrb[6].mxu0 %vm125_vm2, %v2358_v62  ;;  %v2870_v0 = vpop.permute.xlu1 %2869  ;;  %v2877_v1 = vunpack.i.h.bf16 %v2875_v63  ;;  %v2876_v2 = vunpack.i.l.bf16 %v2875_v63  ;;  %vm686_vm2 = vcmask 171008  }
  0xa4   :  { %v2872_v4 = vunpack.i.h.bf16 %v2870_v0  ;;  %v2871_v5 = vunpack.i.l.bf16 %v2870_v0 }
  0xa5   :  { %v2776_v8 = vpack.c.bf16 %v2877_v1, %v2876_v2 }
  0xa6   :  { %v2772_v7 = vpack.c.bf16 %v2872_v4, %v2871_v5  ;;  %v287_v25 = vpop.permute.xlu0 %286 }
  0xa7   :  { %v2880_v9 = vpop.permute.xlu1 %2879 }
  0xa8   :  { %2773 = vmatprep.subr.bf16.mxu0 %v2772_v7  ;;  %2839 = vmatprep.subr.bf16.mxu1 %v2772_v7  ;;  %v2882_v10 = vunpack.i.h.bf16 %v2880_v9  ;;  %v2881_v11 = vunpack.i.l.bf16 %v2880_v9 }
  0xa9   :  { %2775 = vmatpush3.bf16.msra.mxu0 %v2772_v7  ;;  %2842 = vmatpush3.bf16.msra.mxu1 %v2772_v7 }
  0xaa   :  { %v2780_v13 = vpack.c.bf16 %v2882_v10, %v2881_v11  ;;  %2777 = vmatprep.subr.bf16.mxu0 %v2776_v8  ;;  %2840 = vmatprep.subr.bf16.mxu1 %v2776_v8 }
  0xad   :  { %2779 = vmatpush3.bf16.msra.mxu0 %v2776_v8  ;;  %2843 = vmatpush3.bf16.msra.mxu1 %v2776_v8 }
  0xae   :  { %2782 = vmatprep.subr.msk.bf16.mxu0 %vm2781_vm13, %v2780_v13  ;;  %2841 = vmatprep.subr.msk.bf16.mxu1 %vm2781_vm13, %v2780_v13 }
  0xb1   :  { %2785 = vmatpush3.bf16.msk.msra.mxu0 %vm2781_vm13, %v2780_v13  ;;  %2844 = vmatpush3.bf16.msk.msra.mxu1 %vm2781_vm13, %v2780_v13 }
 0x15e   :  { %v3161_v17 = vpop.f32.mrb[0].mxu0 }
 0x15f   :  { %v3163_v18 = vpop.f32.mrb[1].mxu0 }
 0x160   :  { %2585 = vmatprep.mubr.msk.f32.mxu0 %vm289_vm14, %v3163_v18 }
 0x161   :  { %2586 = vmatmul.mubr.msk.f32.vlgmr.msra.gmra.mrb[8].mxu0 %vm289_vm14, %v3161_v17 }
 0x166   :  { %v3169_v19 = vpop.f32.mrb[2].mxu0 }
 0x167   :  { %v3171_v20 = vpop.f32.mrb[3].mxu0 }
 0x168   :  { %2588 = vmatprep.mubr.msk.f32.mxu0 %vm289_vm14, %v3171_v20 }
 0x169   :  { %2589 = vmatmul.mubr.msk.f32.gmra.mrb[10].mxu0 %vm289_vm14, %v3169_v19 }
 0x16e   :  { %v3177_v21 = vpop.f32.mrb[4].mxu0 }
 0x16f   :  { %v3179_v22 = vpop.f32.mrb[5].mxu0 }
 0x170   :  { %2591 = vmatprep.mubr.msk.f32.mxu1 %vm289_vm14, %v3179_v22 }
 0x171   :  { %2592 = vmatmul.mubr.msk.f32.vlgmr.msra.gmra.mrb[0].mxu1 %vm289_vm14, %v3177_v21 }
 0x176   :  { %v3185_v23 = vpop.f32.mrb[6].mxu0 }
 0x177   :  { %v3187_v24 = vpop.f32.mrb[7].mxu0 }
 0x178   :  { %2594 = vmatprep.mubr.msk.f32.mxu1 %vm289_vm14, %v3187_v24 }
 0x179   :  { %2595 = vmatmul.mubr.msk.f32.gmra.mrb[2].mxu1 %vm289_vm14, %v3185_v23 }
 0x17a   :  { %2621 = vmatprep.mubr.msk.f32.mxu1 %vm3042_vm15, %v3036_v36 }
 0x234   :  { %v2587_v26 = vpop.f32.mrb[8].mxu0 }
 0x235   :  { %v3193_v27 = vadd.f32 %v2587_v26, %v287_v25  ;;  %v383_v28 = vpop.f32.mrb[9].mxu0 }
 0x236   :  { %v3195_v29 = vadd.f32 %v383_v28, %v287_v25 }
 0x237   :  { %v2378_v30 = vmul.f32 -1.442695, %v3193_v27  ;;  %488 = vrot.lane.b32.xlu0 %v3193_v27, %s3038_s9 }
 0x238   :  { %v2377_v31 = vmul.f32 -1.442695, %v3195_v29  ;;  %486 = vrot.lane.b32.xlu1 %v3195_v29, %s3038_s9 }
 0x239   :  { %2913 = vpow2.f32 %v2378_v30 }
 0x23a   :  { %2915 = vpow2.f32 %v2377_v31 }
 0x23c   :  { %v2590_v32 = vpop.f32.mrb[10].mxu0 }
 0x23d   :  { %v3203_v33 = vadd.f32 %v2590_v32, %v287_v25  ;;  %v393_v34 = vpop.f32.mrb[11].mxu0 }
 0x23e   :  { %v3205_v35 = vadd.f32 %v393_v34, %v287_v25 }
 0x23f   :  { %v2380_v37 = vmul.f32 -1.442695, %v3203_v33 }
 0x240   :  { %v2379_v38 = vmul.f32 -1.442695, %v3205_v35 }
 0x241   :  { %2917 = vpow2.f32 %v2380_v37 }
 0x242   :  { %2919 = vpow2.f32 %v2379_v38 }
 0x243   :  { %v2914_v39 = vpop.eup %2913 }
 0x244   :  { %v2916_v40 = vpop.eup %2915  ;;  %v447_v41 = vadd.f32 1.0, %v2914_v39  ;;  %v2593_v42 = vpop.f32.mrb[0].mxu1  ;;  %v3040_v39 = vmov 0.0|0.0  }
 0x245   :  { %v446_v43 = vadd.f32 1.0, %v2916_v40  ;;  %v3209_v44 = vadd.f32 %v2593_v42, %v287_v25  ;;  %v403_v45 = vpop.f32.mrb[1].mxu1  ;;  %2790 = vmatprep.subr.bf16.mxu1 %v3040_v39  ;;  %v3279_v40 = vld [vmem:[%s3708_s1 + $0x8] sm:$0xff] }
 0x246   :  { %2921 = vrcp.f32 %v447_v41  ;;  %v3211_v46 = vadd.f32 %v403_v45, %v287_v25  ;;  %v3284_v41 = vld [vmem:[%s3708_s1 + $0x20] sm:$0xff] }
 0x247   :  { %2923 = vrcp.f32 %v446_v43  ;;  %v2382_v47 = vmul.f32 -1.442695, %v3209_v44  ;;  %v3293_v43 = vld [vmem:[%s3708_s1 + $0x38] sm:$0xff]  ;;  %v2893_v45 = vpack.i.bf16 %v3284_v41, %v3080_v6 }
 0x248   :  { %v2381_v48 = vmul.f32 -1.442695, %v3211_v46 }
 0x249   :  { %2925 = vpow2.f32 %v2382_v47  ;;  %v2888_v47 = vpack.i.bf16 %v3279_v40, %v3075_v3 }
 0x24a   :  { %2927 = vpow2.f32 %v2381_v48 }
 0x24b   :  { %v2918_v49 = vpop.eup %2917 }
 0x24c   :  { %v2920_v50 = vpop.eup %2919  ;;  %v449_v51 = vadd.f32 1.0, %v2918_v49  ;;  %v2596_v52 = vpop.f32.mrb[2].mxu1 }
 0x24d   :  { %v448_v53 = vadd.f32 1.0, %v2920_v50  ;;  %v3215_v54 = vadd.f32 %v2596_v52, %v287_v25  ;;  %v413_v55 = vpop.f32.mrb[3].mxu1 }
 0x24e   :  { %2929 = vrcp.f32 %v449_v51  ;;  %v3217_v56 = vadd.f32 %v413_v55, %v287_v25 }
 0x24f   :  { %2931 = vrcp.f32 %v448_v53  ;;  %v2384_v57 = vmul.f32 -1.442695, %v3215_v54  ;;  %v24_v53 = vld [vmem:[%s3708_s1 + $0x80] sm:$0x7] }
 0x250   :  { %v3220_v58 = vpop.eup %2921  ;;  %v2383_v59 = vmul.f32 -1.442695, %v3217_v56 }
 0x251   :  { %v3223_v60 = vpop.eup %2923  ;;  %2933 = vpow2.f32 %v2384_v57  ;;  %v3227_v61 = vmul.f32 %v3220_v58, %v3161_v17  ;;  %v2386_v30 = vadd.f32 -1.0, %v3220_v58  ;;  %v567_v48 = vsub.f32 1.0, %v3220_v58 }
 0x252   :  { %2935 = vpow2.f32 %v2383_v59  ;;  %v3231_v62 = vmul.f32 %v3223_v60, %v3163_v18  ;;  %v2385_v31 = vadd.f32 -1.0, %v3223_v60  ;;  %v566_v6 = vsub.f32 1.0, %v3223_v60 }
 0x253   :  { %v2926_v63 = vpop.eup %2925  ;;  %v3322_v60 = vrot.slane %v24_v53, %v3153_v15  ;;  %v3372_v53 = vld [vmem:[%s3708_s1 + $0x10] sm:$0xff] }
 0x254   :  { %v2928_v0 = vpop.eup %2927  ;;  %v451_v1 = vadd.f32 1.0, %v2926_v63 }
 0x255   :  { %v450_v2 = vadd.f32 1.0, %v2928_v0 }
 0x256   :  { %2937 = vrcp.f32 %v451_v1 }
 0x257   :  { %2939 = vrcp.f32 %v450_v2 }
 0x258   :  { %v3233_v4 = vpop.eup %2929 }
 0x259   :  { %v3235_v5 = vpop.eup %2931  ;;  %v3239_v7 = vmul.f32 %v3233_v4, %v3169_v19 }
 0x25a   :  { %v3243_v8 = vmul.f32 %v3235_v5, %v3171_v20 }
 0x25b   :  { %v2934_v9 = vpop.eup %2933 }
 0x25c   :  { %v2936_v10 = vpop.eup %2935  ;;  %v453_v11 = vadd.f32 1.0, %v2934_v9 }
 0x25d   :  { %v452_v13 = vadd.f32 1.0, %v2936_v10 }
 0x25e   :  { %2941 = vrcp.f32 %v453_v11 }
 0x25f   :  { %2943 = vrcp.f32 %v452_v13 }
 0x260   :  { %v3245_v14 = vpop.eup %2937 }
 0x261   :  { %v3247_v17 = vpop.eup %2939  ;;  %v3251_v18 = vmul.f32 %v3245_v14, %v3177_v21 }
 0x262   :  { %v3255_v19 = vmul.f32 %v3247_v17, %v3179_v22 }
 0x268   :  { %v3257_v20 = vpop.eup %2941 }
 0x269   :  { %v3259_v25 = vpop.eup %2943  ;;  %v3263_v26 = vmul.f32 %v3257_v20, %v3185_v23 }
 0x26a   :  { %v3267_v28 = vmul.f32 %v3259_v25, %v3187_v24 }
 0x2a9   :  { %v489_v21 = vpop.permute.xlu0 %488 }
 0x2aa   :  { %v511_v32 = vmul.f32 %v2386_v30, %v489_v21  ;;  %v487_v22 = vpop.permute.xlu1 %486 }
 0x2ab   :  { %v510_v34 = vmul.f32 %v2385_v31, %v487_v22 }
 0x2ac   :  { %528 = vrot.lane.b32.xlu0 %v511_v32, %s3039_s10 }
 0x2ad   :  { %526 = vrot.lane.b32.xlu1 %v510_v34, %s3039_s10 }
 0x31e   :  { %v529_v37 = vpop.permute.xlu0 %528 }
 0x31f   :  { %v551_v23 = vadd.f32 %v529_v37, %v3193_v27  ;;  %v527_v38 = vpop.permute.xlu1 %526 }
 0x320   :  { %v550_v24 = vadd.f32 %v527_v38, %v3195_v29  ;;  %v2883_v29 = vpack.i.bf16 %v3284_v41, %v3279_v40 }
 0x321   :  { %2945 = vtanh.f32 %v551_v23 }
 0x322   :  { %2947 = vtanh.f32 %v550_v24 }
 0x32b   :  { %v2946_v42 = vpop.eup %2945 }
 0x32c   :  { %v2948_v27 = vpop.eup %2947  ;;  %584 = vrot.lane.b32.xlu0 %v2946_v42, %s3041_s15 }
 0x32d   :  { %582 = vrot.lane.b32.xlu1 %v2948_v27, %s3041_s15 }
 0x330   :  { %815 = vrot.lane.b32.xlu0 %v3293_v43, %s3043_s18 }
 0x331   :  { %2884 = vrot.lane.b32.xlu1 %v2883_v29, %s3043_s18 }
 0x334   :  { %2894 = vrot.lane.b32.xlu0 %v2893_v45, %s3044_s19 }
 0x335   :  { %2889 = vrot.lane.b32.xlu1 %v2888_v47, %s3044_s19 }
 0x338   :  { %671 = vrot.lane.b32.xlu0 %v3293_v43, %s3044_s19 }
 0x339   :  { %669 = vrot.lane.b32.xlu1 %v3093_v12, %s3044_s19 }
 0x39e   :  { %v585_v49 = vpop.permute.xlu0 %584 }
 0x39f   :  { %v607_v50 = vmul.f32 %v585_v49, %v567_v48  ;;  %v583_v51 = vpop.permute.xlu1 %582 }
 0x3a0   :  { %v606_v52 = vmul.f32 %v583_v51, %v566_v6 }
 0x3a1   :  { %v623_v3 = vadd.f32 %v3227_v61, %v607_v50 }
 0x3a2   :  { %v622_v55 = vadd.f32 %v3231_v62, %v606_v52  ;;  %v3317_v57 = vpop.permute.xlu0 %815 }
 0x3a3   :  { %644 = vrot.lane.b32.xlu0 %v623_v3, %s3041_s15  ;;  %v2885_v12 = vpop.permute.xlu1 %2884  ;;  %v3367_v3 = vld [vmem:[%s3708_s1 + $0x28] sm:$0xff] }
 0x3a4   :  { %642 = vrot.lane.b32.xlu1 %v622_v55, %s3041_s15  ;;  %v2887_v58 = vunpack.i.h.bf16 %v2885_v12  ;;  %v2886_v59 = vunpack.i.l.bf16 %v2885_v12  ;;  %v2908_v55 = vpack.i.bf16 %v3367_v3, %v3372_v53  ;;  %v2898_v12 = vpack.i.bf16 %v3372_v53, %v3279_v40  ;;  %v3388_v40 = vld [vmem:[%s3708_s1 + $0x40] sm:$0xff] }
 0x3a6   :  { %v3324_v63 = vpack.c.bf16 %v2887_v58, %v2886_v59  ;;  %v2895_v61 = vpop.permute.xlu0 %2894 }
 0x3a7   :  { %v2897_v0 = vunpack.i.h.bf16 %v2895_v61  ;;  %v2896_v1 = vunpack.i.l.bf16 %v2895_v61  ;;  %v2890_v2 = vpop.permute.xlu1 %2889  ;;  %680 = vrot.lane.b32.xlu0 %v3157_v16, %s3044_s19 }
 0x3a8   :  { %2792 = vmatpush3.bf16.msra.mxu1 %v3324_v63  ;;  %v2892_v62 = vunpack.i.h.bf16 %v2890_v2  ;;  %v2891_v9 = vunpack.i.l.bf16 %v2890_v2  ;;  %819 = vrot.lane.b32.xlu1 %v3322_v60, %s3043_s18 }
 0x3a9   :  { %2619 = vmatprep.subr.mxu1 %v3036_v36  ;;  %v675_v10 = vsel %vm673_vm0, %v2896_v1, %v2897_v0  ;;  %v2903_v0 = vpack.i.bf16 %v3367_v3, %v3284_v41 }
 0x3aa   :  { %v674_v11 = vsel %vm673_vm0, %v2891_v9, %v2892_v62  ;;  %v672_v13 = vpop.permute.xlu0 %671 }
 0x3ab   :  { %v2786_v30 = vpack.c.bf16 %v675_v10, %v674_v11  ;;  %v670_v21 = vpop.permute.xlu1 %669 }
 0x3ac   :  { %2620 = vmatpush3.msk.msra.mxu1 %vm703_vm1, %v3317_v57  ;;  %v676_v16 = vsel %vm673_vm0, %v670_v21, %v672_v13  ;;  %682 = vrot.lane.b32.xlu1 %v3322_v60, %s3044_s19 }
 0x3ad   :  { %2622 = vmatmul.mubr.f32.vlgmr.msra.gmra.mrb[4].mxu1 %v3036_v36  ;;  %2787 = vmatprep.subr.bf16.mxu0 %v2786_v30 }
 0x3ae   :  { %2789 = vmatpush3.bf16.msra.mxu0 %v2786_v30  ;;  %2793 = vmatprep.subr.bf16.mxu1 %v3040_v39 }
 0x3af   :  { %2601 = vmatprep.subr.msk.mxu0 %vm703_vm1, %v676_v16  ;;  %2630 = vmatprep.mubr.msk.f32.mxu1 %vm3042_vm15, %v3036_v36 }
 0x3b2   :  { %2602 = vmatpush3.msk.msra.mxu0 %vm703_vm1, %v676_v16 }
 0x3b3   :  { %2796 = vmatprep.subr.bf16.mxu0 %v3040_v39 }
 0x415   :  { %v645_v32 = vpop.permute.xlu0 %644 }
 0x416   :  { %v643_v31 = vpop.permute.xlu1 %642 }
 0x417   :  { %2603 = vmatprep.mubr.msk.f32.mxu0 %vm686_vm2, %v643_v31 }
 0x418   :  { %2604 = vmatmul.mubr.msk.f32.vlgmr.msra.gmra.mrb[12].mxu0 %vm686_vm2, %v645_v32 }
 0x419   :  { %2798 = vmatpush3.bf16.msra.mxu0 %v3324_v63  ;;  %v681_v38 = vpop.permute.xlu0 %680 }
 0x41a   :  { %2637 = vmatprep.subr.mxu0 %v3036_v36  ;;  %v3353_v22 = vpop.permute.xlu1 %819 }
 0x41d   :  { %2638 = vmatpush3.msk.msra.mxu0 %vm703_vm1, %v3317_v57 }
 0x41e   :  { %2802 = vmatprep.subr.bf16.mxu0 %v3040_v39  ;;  %v683_v24 = vpop.permute.xlu1 %682 }
 0x41f   :  { %v3358_v42 = vsel %vm673_vm0, %v681_v38, %v683_v24 }
 0x480   :  { %v893_v34 = vpop.f32.mrb[4].mxu1 }
 0x481   :  { %v2623_v37 = vpop.f32.mrb[5].mxu1  ;;  %v894_v23 = vadd.f32 %v893_v34, %v3353_v22 }
 0x483   :  { %905 = vrot.lane.b32.xlu0 %v894_v23, %s3035_s0 }
 0x4eb   :  { %v3360_v27 = vpop.f32.mrb[12].mxu0 }
 0x4ec   :  { %v772_v29 = vpop.f32.mrb[13].mxu0 }
 0x4ed   :  { %v773_v45 = vadd.f32 %v772_v29, %v3358_v42 }
 0x4ef   :  { %v897_v47 = vadd.f32 %v894_v23, %v773_v45  ;;  %v2387_v23 = vadd.f32 -1.0, %v3235_v5 }
 0x4f1   :  { %v2403_v48 = vmul.f32 -1.442695, %v897_v47 }
 0x4f3   :  { %2949 = vpow2.f32 %v2403_v48 }
 0x4f5   :  { %v906_v50 = vpop.permute.xlu0 %905 }
 0x4fd   :  { %v2950_v49 = vpop.eup %2949 }
 0x4fe   :  { %v901_v6 = vadd.f32 1.0, %v2950_v49  ;;  %v2391_v49 = vadd.f32 -1.0, %v3259_v25 }
 0x500   :  { %2951 = vrcp.f32 %v901_v6 }
 0x50a   :  { %v2952_v51 = vpop.eup %2951 }
 0x50b   :  { %v908_v52 = vmul.f32 %v2952_v51, %v906_v50  ;;  %v921_v2 = vmul.f32 0.0, %v2952_v51 }
 0x50d   :  { %910 = vrot.lane.b32.xlu1 %v908_v52, %s3039_s10  ;;  %v2388_v52 = vadd.f32 -1.0, %v3233_v4 }
 0x511   :  { %2899 = vrot.lane.b32.xlu1 %v2898_v12, %s3045_s26 }
 0x515   :  { %941 = vrot.lane.b32.xlu1 %v3293_v43, %s3045_s26  ;;  %v915_v43 = vsub.f32 1.0, %v2952_v51 }
 0x57f   :  { %v911_v58 = vpop.permute.xlu1 %910 }
 0x580   :  { %v913_v59 = vadd.f32 %v911_v58, %v773_v45  ;;  %v2389_v45 = vadd.f32 -1.0, %v3247_v17 }
 0x582   :  { %2953 = vtanh.f32 %v913_v59  ;;  %v2390_v59 = vadd.f32 -1.0, %v3245_v14 }
 0x583   :  { %v2900_v41 = vpop.permute.xlu1 %2899 }
 0x584   :  { %v2902_v9 = vunpack.i.h.bf16 %v2900_v41  ;;  %v2901_v10 = vunpack.i.l.bf16 %v2900_v41 }
 0x586   :  { %v946_v16 = vsel %vm945_vm3, %v2901_v10, %v2902_v9 }
 0x587   :  { %v942_v37 = vpop.permute.xlu1 %941 }
 0x58c   :  { %v2954_v61 = vpop.eup %2953 }
 0x58d   :  { %917 = vrot.lane.b32.xlu0 %v2954_v61, %s3041_s15 }
 0x591   :  { %2904 = vrot.lane.b32.xlu0 %v2903_v0, %s3045_s26 }
 0x595   :  { %943 = vrot.lane.b32.xlu0 %v3388_v40, %s3045_s26 }
 0x599   :  { %490 = vrot.lane.b32.xlu0 %v3205_v35, %s3038_s9 }
 0x59d   :  { %494 = vrot.lane.b32.xlu0 %v3211_v46, %s3038_s9 }
 0x5a1   :  { %498 = vrot.lane.b32.xlu0 %v3217_v56, %s3038_s9 }
 0x5ff   :  { %v918_v1 = vpop.permute.xlu0 %917 }
 0x600   :  { %v920_v62 = vmul.f32 %v918_v1, %v915_v43  ;;  %v2392_v1 = vadd.f32 -1.0, %v3257_v20 }
 0x602   :  { %v922_v11 = vadd.f32 %v921_v2, %v920_v62 }
 0x603   :  { %v2905_v13 = vpop.permute.xlu0 %2904 }
 0x604   :  { %v2907_v30 = vunpack.i.h.bf16 %v2905_v13  ;;  %v2906_v21 = vunpack.i.l.bf16 %v2905_v13  ;;  %928 = vrot.lane.b32.xlu1 %v922_v11, %s3041_s15 }
 0x606   :  { %v947_v31 = vsel %vm945_vm3, %v2906_v21, %v2907_v30 }
 0x607   :  { %v944_v32 = vpop.permute.xlu0 %943  ;;  %v3401_v34 = vpack.c.bf16 %v947_v31, %v946_v16 }
 0x608   :  { %492 = vrot.lane.b32.xlu1 %v3203_v33, %s3038_s9  ;;  %v3408_v38 = vsel %vm945_vm3, %v942_v37, %v944_v32 }
 0x609   :  { %2795 = vmatpush3.bf16.msra.mxu1 %v3401_v34 }
 0x60a   :  { %2628 = vmatprep.subr.mxu1 %v3036_v36 }
 0x60b   :  { %v491_v24 = vpop.permute.xlu0 %490 }
 0x60c   :  { %v512_v29 = vmul.f32 %v2387_v23, %v491_v24  ;;  %496 = vrot.lane.b32.xlu1 %v3209_v44, %s3038_s9  ;;  %v568_v24 = vsub.f32 1.0, %v3235_v5  ;;  %v572_v5 = vsub.f32 1.0, %v3259_v25 }
 0x60d   :  { %2629 = vmatpush3.msk.msra.mxu1 %vm703_vm1, %v3408_v38 }
 0x60e   :  { %530 = vrot.lane.b32.xlu0 %v512_v29, %s3039_s10  ;;  %2799 = vmatprep.subr.bf16.mxu1 %v3040_v39 }
 0x60f   :  { %v495_v47 = vpop.permute.xlu0 %494 }
 0x610   :  { %v514_v48 = vmul.f32 %v2389_v45, %v495_v47  ;;  %500 = vrot.lane.b32.xlu1 %v3215_v54, %s3038_s9 }
 0x612   :  { %534 = vrot.lane.b32.xlu0 %v514_v48, %s3039_s10  ;;  %v570_v48 = vsub.f32 1.0, %v3247_v17 }
 0x613   :  { %v499_v6 = vpop.permute.xlu0 %498 }
 0x614   :  { %v516_v50 = vmul.f32 %v2391_v49, %v499_v6 }
 0x616   :  { %538 = vrot.lane.b32.xlu0 %v516_v50, %s3039_s10 }
 0x676   :  { %v3423_v51 = vpop.permute.xlu1 %928 }
 0x677   :  { %2631 = vmatmul.mubr.msk.f32.vlgmr.msra.gmra.mrb[6].mxu1 %vm686_vm2, %v3423_v51 }
 0x678   :  { %2801 = vmatpush3.bf16.msra.mxu1 %v3401_v34  ;;  %2648 = vmatprep.mubr.msk.f32.mxu1 %vm3042_vm15, %v3036_v36 }
 0x679   :  { %2646 = vmatprep.subr.mxu1 %v3036_v36 }
 0x67a   :  { %v493_v12 = vpop.permute.xlu1 %492 }
 0x67b   :  { %v513_v58 = vmul.f32 %v2388_v52, %v493_v12 }
 0x67c   :  { %2647 = vmatpush3.msk.msra.mxu1 %vm703_vm1, %v3408_v38 }
 0x67d   :  { %532 = vrot.lane.b32.xlu1 %v513_v58, %s3039_s10  ;;  %2805 = vmatprep.subr.bf16.mxu1 %v3040_v39  ;;  %v569_v58 = vsub.f32 1.0, %v3233_v4 }
 0x67e   :  { %v497_v61 = vpop.permute.xlu1 %496 }
 0x67f   :  { %v515_v0 = vmul.f32 %v2390_v59, %v497_v61 }
 0x680   :  { %v531_v41 = vpop.permute.xlu0 %530 }
 0x681   :  { %v552_v43 = vadd.f32 %v531_v41, %v3205_v35  ;;  %536 = vrot.lane.b32.xlu1 %v515_v0, %s3039_s10  ;;  %v571_v41 = vsub.f32 1.0, %v3245_v14 }
 0x682   :  { %v501_v2 = vpop.permute.xlu1 %500 }
 0x683   :  { %2955 = vtanh.f32 %v552_v43  ;;  %v517_v62 = vmul.f32 %v2392_v1, %v501_v2  ;;  %v573_v1 = vsub.f32 1.0, %v3257_v20 }
 0x684   :  { %v535_v9 = vpop.permute.xlu0 %534 }
 0x685   :  { %v554_v10 = vadd.f32 %v535_v9, %v3211_v46  ;;  %540 = vrot.lane.b32.xlu1 %v517_v62, %s3039_s10 }
 0x687   :  { %2957 = vtanh.f32 %v554_v10 }
 0x688   :  { %v539_v11 = vpop.permute.xlu0 %538 }
 0x689   :  { %v556_v13 = vadd.f32 %v539_v11, %v3217_v56 }
 0x68b   :  { %2959 = vtanh.f32 %v556_v13 }
 0x68d   :  { %v2956_v30 = vpop.eup %2955 }
 0x68e   :  { %586 = vrot.lane.b32.xlu0 %v2956_v30, %s3041_s15 }
 0x691   :  { %v2958_v35 = vpop.eup %2957 }
 0x692   :  { %590 = vrot.lane.b32.xlu0 %v2958_v35, %s3041_s15 }
 0x695   :  { %v2960_v21 = vpop.eup %2959 }
 0x696   :  { %594 = vrot.lane.b32.xlu0 %v2960_v21, %s3041_s15 }
 0x6ef   :  { %v533_v16 = vpop.permute.xlu1 %532 }
 0x6f0   :  { %v553_v31 = vadd.f32 %v533_v16, %v3203_v33 }
 0x6f2   :  { %2961 = vtanh.f32 %v553_v31 }
 0x6f3   :  { %v537_v46 = vpop.permute.xlu1 %536 }
 0x6f4   :  { %v555_v32 = vadd.f32 %v537_v46, %v3209_v44 }
 0x6f6   :  { %2963 = vtanh.f32 %v555_v32 }
 0x6f7   :  { %v541_v37 = vpop.permute.xlu1 %540 }
 0x6f8   :  { %v557_v56 = vadd.f32 %v541_v37, %v3215_v54 }
 0x6fa   :  { %2965 = vtanh.f32 %v557_v56 }
 0x6fc   :  { %v2962_v23 = vpop.eup %2961 }
 0x6fd   :  { %588 = vrot.lane.b32.xlu1 %v2962_v23, %s3041_s15 }
 0x700   :  { %v2964_v29 = vpop.eup %2963  ;;  %v587_v45 = vpop.permute.xlu0 %586 }
 0x701   :  { %v608_v47 = vmul.f32 %v587_v45, %v568_v24  ;;  %592 = vrot.lane.b32.xlu1 %v2964_v29, %s3041_s15  ;;  %v778_v24 = vadd.f32 %v3360_v27, %v3358_v42 }
 0x703   :  { %v624_v33 = vadd.f32 %v3243_v8, %v608_v47  ;;  %v25_v8 = vld [vmem:[%s3708_s1 + $0x88] sm:$0x7]  ;;  %s3046_s1 = smov 21  }
 0x704   :  { %v2966_v44 = vpop.eup %2965  ;;  %v591_v49 = vpop.permute.xlu0 %590  ;;  %v3465_v12 = vrot.slane %v25_v8, %v3153_v15 }
 0x705   :  { %v610_v6 = vmul.f32 %v591_v49, %v570_v48  ;;  %646 = vrot.lane.b32.xlu0 %v624_v33, %s3041_s15  ;;  %596 = vrot.lane.b32.xlu1 %v2966_v44, %s3041_s15 }
 0x707   :  { %v626_v54 = vadd.f32 %v3255_v19, %v610_v6 }
 0x708   :  { %v595_v50 = vpop.permute.xlu0 %594 }
 0x709   :  { %v612_v52 = vmul.f32 %v595_v50, %v572_v5  ;;  %650 = vrot.lane.b32.xlu0 %v626_v54, %s3041_s15 }
 0x70b   :  { %v628_v17 = vadd.f32 %v3267_v28, %v612_v52 }
 0x70d   :  { %654 = vrot.lane.b32.xlu0 %v628_v17, %s3041_s15 }
 0x711   :  { %954 = vrot.lane.b32.xlu0 %v3465_v12, %s3045_s26 }
 0x74a   :  { %v1028_v19 = vpop.f32.mrb[6].mxu1 }
 0x74b   :  { %v2632_v25 = vpop.f32.mrb[7].mxu1 }
 0x76f   :  { %v589_v59 = vpop.permute.xlu1 %588 }
 0x770   :  { %v609_v61 = vmul.f32 %v589_v59, %v569_v58 }
 0x772   :  { %v625_v0 = vadd.f32 %v3239_v7, %v609_v61 }
 0x773   :  { %v593_v43 = vpop.permute.xlu1 %592 }
 0x774   :  { %v611_v28 = vmul.f32 %v593_v43, %v571_v41  ;;  %648 = vrot.lane.b32.xlu1 %v625_v0, %s3041_s15 }
 0x776   :  { %v627_v15 = vadd.f32 %v3251_v18, %v611_v28 }
 0x777   :  { %v647_v2 = vpop.permute.xlu0 %646  ;;  %v597_v62 = vpop.permute.xlu1 %596 }
 0x778   :  { %v613_v9 = vmul.f32 %v597_v62, %v573_v1  ;;  %2606 = vmatprep.mubr.msk.f32.mxu0 %vm686_vm2, %v647_v2  ;;  %652 = vrot.lane.b32.xlu1 %v627_v15, %s3041_s15 }
 0x77a   :  { %v629_v4 = vadd.f32 %v3263_v26, %v613_v9 }
 0x77b   :  { %v651_v7 = vpop.permute.xlu0 %650 }
 0x77c   :  { %952 = vrot.lane.b32.xlu1 %v3322_v60, %s3045_s26 }
 0x77f   :  { %v655_v18 = vpop.permute.xlu0 %654 }
 0x780   :  { %656 = vrot.lane.b32.xlu1 %v629_v4, %s3041_s15 }
 0x783   :  { %v955_v10 = vpop.permute.xlu0 %954 }
 0x7e6   :  { %v649_v14 = vpop.permute.xlu1 %648 }
 0x7e7   :  { %2607 = vmatmul.mubr.msk.f32.gmra.mrb[14].mxu0 %vm686_vm2, %v649_v14 }
 0x7e8   :  { %2609 = vmatprep.mubr.msk.f32.mxu0 %vm686_vm2, %v651_v7 }
 0x7ea   :  { %v653_v20 = vpop.permute.xlu1 %652 }
 0x7eb   :  { %2610 = vmatmul.mubr.msk.f32.gmra.mrb[16].mxu0 %vm686_vm2, %v653_v20 }
 0x7ec   :  { %2612 = vmatprep.mubr.msk.f32.mxu0 %vm686_vm2, %v655_v18 }
 0x7ee   :  { %v953_v11 = vpop.permute.xlu1 %952 }
 0x7ef   :  { %v3486_v26 = vsel %vm945_vm3, %v953_v11, %v955_v10 }
 0x7f0   :  { %v1029_v60 = vadd.f32 %v1028_v19, %v3486_v26 }
 0x7f2   :  { %v657_v13 = vpop.permute.xlu1 %656  ;;  %v1032_v30 = vmax.f32 %v1029_v60, 0.0 }
 0x7f3   :  { %2613 = vmatmul.mubr.msk.f32.gmra.mrb[18].mxu0 %vm686_vm2, %v657_v13 }
 0x7f4   :  { %2639 = vmatprep.mubr.msk.f32.mxu0 %vm3042_vm15, %v3036_v36 }
 0x7f7   :  { %2640 = vmatmul.mubr.msk.f32.vlgmr.msra.gmra.mrb[20].mxu0 %vm686_vm2, %v1032_v30 }
 0x7f8   :  { %2804 = vmatpush3.bf16.msra.mxu0 %v3324_v63  ;;  %2657 = vmatprep.mubr.msk.f32.mxu0 %vm3042_vm15, %v3036_v36 }
 0x7f9   :  { %2655 = vmatprep.subr.mxu0 %v3036_v36 }
 0x7fc   :  { %2656 = vmatpush3.msk.msra.mxu0 %vm703_vm1, %v3317_v57 }
 0x7fd   :  { %2808 = vmatprep.subr.bf16.mxu0 %v3040_v39 }
 0x8ba   :  { %v3500_v35 = vpop.f32.mrb[14].mxu0 }
 0x8bb   :  { %v782_v21 = vpop.f32.mrb[15].mxu0 }
 0x8bc   :  { %v783_v15 = vadd.f32 %v782_v21, %v3358_v42 }
 0x8be   :  { %v3502_v16 = vpop.f32.mrb[16].mxu0 }
 0x8bf   :  { %v3504_v31 = vpop.f32.mrb[17].mxu0 }
 0x8c6   :  { %v3506_v46 = vpop.f32.mrb[18].mxu0 }
 0x8c7   :  { %v3508_v32 = vpop.f32.mrb[19].mxu0 }
 0x8ca   :  { %v1102_v37 = vpop.f32.mrb[20].mxu0 }
 0x8cb   :  { %v1103_v56 = vadd.f32 %v1102_v37, %v3353_v22  ;;  %v2641_v23 = vpop.f32.mrb[21].mxu0 }
 0x8cd   :  { %1114 = vrot.lane.b32.xlu0 %v1103_v56, %s3035_s0  ;;  %v1106_v29 = vadd.f32 %v1103_v56, %v778_v24 }
 0x8cf   :  { %v2408_v45 = vmul.f32 -1.442695, %v1106_v29 }
 0x8d1   :  { %2967 = vpow2.f32 %v2408_v45 }
 0x8db   :  { %v2968_v47 = vpop.eup %2967 }
 0x8dc   :  { %v1110_v33 = vadd.f32 1.0, %v2968_v47 }
 0x8de   :  { %2969 = vrcp.f32 %v1110_v33 }
 0x8e8   :  { %v2970_v48 = vpop.eup %2969 }
 0x8e9   :  { %v1124_v50 = vsub.f32 1.0, %v2970_v48 }
 0x93f   :  { %v1115_v44 = vpop.permute.xlu0 %1114 }
 0x940   :  { %v1117_v49 = vmul.f32 %v2970_v48, %v1115_v44  ;;  %v788_v44 = vadd.f32 %v3500_v35, %v3358_v42 }
 0x942   :  { %1119 = vrot.lane.b32.xlu1 %v1117_v49, %s3039_s10 }
 0x946   :  { %1130 = vrot.lane.b32.xlu1 %v1032_v30, %s3046_s1 }
 0x9b4   :  { %v1120_v6 = vpop.permute.xlu1 %1119 }
 0x9b5   :  { %v1122_v54 = vadd.f32 %v1120_v6, %v778_v24 }
 0x9b7   :  { %2971 = vtanh.f32 %v1122_v54 }
 0x9b8   :  { %v1131_v27 = vpop.permute.xlu1 %1130 }
 0x9b9   :  { %v1133_v8 = vmul.f32 %v2970_v48, %v1131_v27 }
 0x9c1   :  { %v2972_v5 = vpop.eup %2971 }
 0x9c2   :  { %1126 = vrot.lane.b32.xlu0 %v2972_v5, %s3041_s15 }
 0xa34   :  { %v1127_v52 = vpop.permute.xlu0 %1126 }
 0xa35   :  { %v1129_v17 = vmul.f32 %v1127_v52, %v1124_v50 }
 0xa37   :  { %v1134_v19 = vadd.f32 %v1133_v8, %v1129_v17 }
 0xa39   :  { %1136 = vrot.lane.b32.xlu0 %v1134_v19, %s3041_s15 }
 0xaab   :  { %v3518_v25 = vpop.permute.xlu0 %1136 }
 0xaac   :  { %2649 = vmatmul.mubr.msk.f32.vlgmr.msra.gmra.mrb[8].mxu1 %vm686_vm2, %v3518_v25 }
 0xaad   :  { %2807 = vmatpush3.bf16.msra.mxu1 %v3401_v34  ;;  %2666 = vmatprep.mubr.msk.f32.mxu1 %vm3042_vm15, %v3036_v36 }
 0xaae   :  { %2664 = vmatprep.subr.mxu1 %v3036_v36 }
 0xab1   :  { %2665 = vmatpush3.msk.msra.mxu1 %vm703_vm1, %v3408_v38 }
 0xab2   :  { %2811 = vmatprep.subr.bf16.mxu1 %v3040_v39 }
 0xb7f   :  { %v1206_v58 = vpop.f32.mrb[8].mxu1 }
 0xb80   :  { %v1207_v59 = vadd.f32 %v1206_v58, %v3486_v26  ;;  %v2650_v61 = vpop.f32.mrb[9].mxu1 }
 0xb82   :  { %v1210_v0 = vmax.f32 %v1207_v59, 0.0 }
 0xb84   :  { %2658 = vmatmul.mubr.msk.f32.vlgmr.msra.gmra.mrb[22].mxu0 %vm686_vm2, %v1210_v0 }
 0xb85   :  { %2810 = vmatpush3.bf16.msra.mxu0 %v3324_v63  ;;  %2675 = vmatprep.mubr.msk.f32.mxu0 %vm3042_vm15, %v3036_v36 }
 0xb86   :  { %2673 = vmatprep.subr.mxu0 %v3036_v36 }
 0xb89   :  { %2674 = vmatpush3.msk.msra.mxu0 %vm703_vm1, %v3317_v57 }
 0xb8a   :  { %2814 = vmatprep.subr.bf16.mxu0 %v3040_v39 }
 0xc57   :  { %v1280_v41 = vpop.f32.mrb[22].mxu0 }
 0xc58   :  { %v1281_v43 = vadd.f32 %v1280_v41, %v3353_v22  ;;  %v2659_v28 = vpop.f32.mrb[23].mxu0 }
 0xc5a   :  { %1292 = vrot.lane.b32.xlu1 %v1281_v43, %s3035_s0  ;;  %v1284_v1 = vadd.f32 %v1281_v43, %v783_v15 }
 0xc5c   :  { %v2413_v2 = vmul.f32 -1.442695, %v1284_v1 }
 0xc5e   :  { %2973 = vpow2.f32 %v2413_v2 }
 0xc68   :  { %v2974_v62 = vpop.eup %2973 }
 0xc69   :  { %v1288_v9 = vadd.f32 1.0, %v2974_v62 }
 0xc6b   :  { %2975 = vrcp.f32 %v1288_v9 }
 0xc75   :  { %v2976_v4 = vpop.eup %2975 }
 0xc76   :  { %v1302_v60 = vsub.f32 1.0, %v2976_v4 }
 0xccc   :  { %v1293_v7 = vpop.permute.xlu1 %1292 }
 0xccd   :  { %v1295_v14 = vmul.f32 %v2976_v4, %v1293_v7  ;;  %v793_v7 = vadd.f32 %v3504_v31, %v3358_v42 }
 0xccf   :  { %1297 = vrot.lane.b32.xlu0 %v1295_v14, %s3039_s10 }
 0xcd3   :  { %1308 = vrot.lane.b32.xlu0 %v1210_v0, %s3046_s1 }
 0xd41   :  { %v1298_v18 = vpop.permute.xlu0 %1297 }
 0xd42   :  { %v1300_v20 = vadd.f32 %v1298_v18, %v783_v15 }
 0xd44   :  { %2977 = vtanh.f32 %v1300_v20 }
 0xd45   :  { %v1309_v11 = vpop.permute.xlu0 %1308 }
 0xd46   :  { %v1311_v30 = vmul.f32 %v2976_v4, %v1309_v11 }
 0xd4e   :  { %v2978_v10 = vpop.eup %2977 }
 0xd4f   :  { %1304 = vrot.lane.b32.xlu1 %v2978_v10, %s3041_s15 }
 0xdc1   :  { %v1305_v13 = vpop.permute.xlu1 %1304 }
 0xdc2   :  { %v1307_v21 = vmul.f32 %v1305_v13, %v1302_v60 }
 0xdc4   :  { %v1312_v37 = vadd.f32 %v1311_v30, %v1307_v21 }
 0xdc6   :  { %1314 = vrot.lane.b32.xlu1 %v1312_v37, %s3041_s15 }
 0xe38   :  { %v3545_v56 = vpop.permute.xlu1 %1314 }
 0xe39   :  { %2667 = vmatmul.mubr.msk.f32.vlgmr.msra.gmra.mrb[10].mxu1 %vm686_vm2, %v3545_v56 }
 0xe3a   :  { %2813 = vmatpush3.bf16.msra.mxu1 %v3401_v34  ;;  %2684 = vmatprep.mubr.msk.f32.mxu1 %vm3042_vm15, %v3036_v36 }
 0xe3b   :  { %2682 = vmatprep.subr.mxu1 %v3036_v36 }
 0xe3e   :  { %2683 = vmatpush3.msk.msra.mxu1 %vm703_vm1, %v3408_v38 }
 0xe3f   :  { %2817 = vmatprep.subr.bf16.mxu1 %v3040_v39 }
 0xf0c   :  { %v1384_v23 = vpop.f32.mrb[10].mxu1 }
 0xf0d   :  { %v1385_v24 = vadd.f32 %v1384_v23, %v3486_v26  ;;  %v2668_v29 = vpop.f32.mrb[11].mxu1 }
 0xf0f   :  { %v1388_v45 = vmax.f32 %v1385_v24, 0.0 }
 0xf11   :  { %2676 = vmatmul.mubr.msk.f32.vlgmr.msra.gmra.mrb[24].mxu0 %vm686_vm2, %v1388_v45 }
 0xf12   :  { %2816 = vmatpush3.bf16.msra.mxu0 %v3324_v63  ;;  %2693 = vmatprep.mubr.msk.f32.mxu0 %vm3042_vm15, %v3036_v36 }
 0xf13   :  { %2691 = vmatprep.subr.mxu0 %v3036_v36 }
 0xf16   :  { %2692 = vmatpush3.msk.msra.mxu0 %vm703_vm1, %v3317_v57 }
 0xf17   :  { %2820 = vmatprep.subr.bf16.mxu0 %v3040_v39 }
 0xfe4   :  { %v1458_v47 = vpop.f32.mrb[24].mxu0 }
 0xfe5   :  { %v1459_v33 = vadd.f32 %v1458_v47, %v3353_v22  ;;  %v2677_v48 = vpop.f32.mrb[25].mxu0 }
 0xfe7   :  { %1470 = vrot.lane.b32.xlu0 %v1459_v33, %s3035_s0  ;;  %v1462_v49 = vadd.f32 %v1459_v33, %v788_v44 }
 0xfe9   :  { %v2418_v6 = vmul.f32 -1.442695, %v1462_v49 }
 0xfeb   :  { %2979 = vpow2.f32 %v2418_v6 }
 0xff5   :  { %v2980_v54 = vpop.eup %2979 }
 0xff6   :  { %v1466_v5 = vadd.f32 1.0, %v2980_v54 }
 0xff8   :  { %2981 = vrcp.f32 %v1466_v5 }
0x1002   :  { %v2982_v27 = vpop.eup %2981 }
0x1003   :  { %v1480_v58 = vsub.f32 1.0, %v2982_v27 }
0x1059   :  { %v1471_v50 = vpop.permute.xlu0 %1470 }
0x105a   :  { %v1473_v52 = vmul.f32 %v2982_v27, %v1471_v50  ;;  %v798_v50 = vadd.f32 %v3502_v16, %v3358_v42 }
0x105c   :  { %1475 = vrot.lane.b32.xlu1 %v1473_v52, %s3039_s10 }
0x1060   :  { %1486 = vrot.lane.b32.xlu1 %v1388_v45, %s3046_s1 }
0x10ce   :  { %v1476_v8 = vpop.permute.xlu1 %1475 }
0x10cf   :  { %v1478_v17 = vadd.f32 %v1476_v8, %v788_v44 }
0x10d1   :  { %2983 = vtanh.f32 %v1478_v17 }
0x10d2   :  { %v1487_v35 = vpop.permute.xlu1 %1486 }
0x10d3   :  { %v1489_v61 = vmul.f32 %v2982_v27, %v1487_v35 }
0x10db   :  { %v2984_v19 = vpop.eup %2983 }
0x10dc   :  { %1482 = vrot.lane.b32.xlu0 %v2984_v19, %s3041_s15 }
0x114e   :  { %v1483_v59 = vpop.permute.xlu0 %1482 }
0x114f   :  { %v1485_v0 = vmul.f32 %v1483_v59, %v1480_v58 }
0x1151   :  { %v1490_v41 = vadd.f32 %v1489_v61, %v1485_v0 }
0x1153   :  { %1492 = vrot.lane.b32.xlu0 %v1490_v41, %s3041_s15 }
0x11c5   :  { %v3573_v43 = vpop.permute.xlu0 %1492 }
0x11c6   :  { %2685 = vmatmul.mubr.msk.f32.vlgmr.msra.gmra.mrb[12].mxu1 %vm686_vm2, %v3573_v43 }
0x11c7   :  { %2819 = vmatpush3.bf16.msra.mxu1 %v3401_v34  ;;  %2702 = vmatprep.mubr.msk.f32.mxu1 %vm3042_vm15, %v3036_v36 }
0x11c8   :  { %2700 = vmatprep.subr.mxu1 %v3036_v36 }
0x11cb   :  { %2701 = vmatpush3.msk.msra.mxu1 %vm703_vm1, %v3408_v38 }
0x11cc   :  { %2823 = vmatprep.subr.bf16.mxu1 %v3040_v39 }
0x1299   :  { %v1562_v28 = vpop.f32.mrb[12].mxu1 }
0x129a   :  { %v1563_v15 = vadd.f32 %v1562_v28, %v3486_v26  ;;  %v2686_v1 = vpop.f32.mrb[13].mxu1 }
0x129c   :  { %v1566_v2 = vmax.f32 %v1563_v15, 0.0 }
0x129e   :  { %2694 = vmatmul.mubr.msk.f32.vlgmr.msra.gmra.mrb[26].mxu0 %vm686_vm2, %v1566_v2 }
0x129f   :  { %2822 = vmatpush3.bf16.msra.mxu0 %v3324_v63  ;;  %2711 = vmatprep.mubr.msk.f32.mxu0 %vm3042_vm15, %v3036_v36 }
0x12a0   :  { %2709 = vmatprep.subr.mxu0 %v3036_v36 }
0x12a3   :  { %2710 = vmatpush3.msk.msra.mxu0 %vm703_vm1, %v3317_v57 }
0x12a4   :  { %2826 = vmatprep.subr.bf16.mxu0 %v3040_v39 }
0x1371   :  { %v1636_v62 = vpop.f32.mrb[26].mxu0 }
0x1372   :  { %v1637_v9 = vadd.f32 %v1636_v62, %v3353_v22  ;;  %v2695_v4 = vpop.f32.mrb[27].mxu0 }
0x1374   :  { %1648 = vrot.lane.b32.xlu1 %v1637_v9, %s3035_s0  ;;  %v1640_v14 = vadd.f32 %v1637_v9, %v793_v7 }
0x1376   :  { %v2423_v18 = vmul.f32 -1.442695, %v1640_v14 }
0x1378   :  { %2985 = vpow2.f32 %v2423_v18 }
0x1382   :  { %v2986_v20 = vpop.eup %2985 }
0x1383   :  { %v1644_v10 = vadd.f32 1.0, %v2986_v20  ;;  %v803_v20 = vadd.f32 %v3508_v32, %v3358_v42 }
0x1385   :  { %2987 = vrcp.f32 %v1644_v10 }
0x138f   :  { %v2988_v11 = vpop.eup %2987 }
0x1390   :  { %v1658_v23 = vsub.f32 1.0, %v2988_v11 }
0x13e6   :  { %v1649_v60 = vpop.permute.xlu1 %1648 }
0x13e7   :  { %v1651_v13 = vmul.f32 %v2988_v11, %v1649_v60 }
0x13e9   :  { %1653 = vrot.lane.b32.xlu0 %v1651_v13, %s3039_s10 }
0x13ed   :  { %1664 = vrot.lane.b32.xlu0 %v1566_v2, %s3046_s1 }
0x145b   :  { %v1654_v30 = vpop.permute.xlu0 %1653 }
0x145c   :  { %v1656_v21 = vadd.f32 %v1654_v30, %v793_v7 }
0x145e   :  { %2989 = vtanh.f32 %v1656_v21 }
0x145f   :  { %v1665_v31 = vpop.permute.xlu0 %1664 }
0x1460   :  { %v1667_v29 = vmul.f32 %v2988_v11, %v1665_v31 }
0x1468   :  { %v2990_v37 = vpop.eup %2989 }
0x1469   :  { %1660 = vrot.lane.b32.xlu1 %v2990_v37, %s3041_s15 }
0x14db   :  { %v1661_v24 = vpop.permute.xlu1 %1660 }
0x14dc   :  { %v1663_v45 = vmul.f32 %v1661_v24, %v1658_v23 }
0x14de   :  { %v1668_v47 = vadd.f32 %v1667_v29, %v1663_v45 }
0x14e0   :  { %1670 = vrot.lane.b32.xlu1 %v1668_v47, %s3041_s15 }
0x1552   :  { %v3601_v33 = vpop.permute.xlu1 %1670 }
0x1553   :  { %2703 = vmatmul.mubr.msk.f32.vlgmr.msra.gmra.mrb[14].mxu1 %vm686_vm2, %v3601_v33 }
0x1554   :  { %2825 = vmatpush3.bf16.msra.mxu1 %v3401_v34  ;;  %2720 = vmatprep.mubr.msk.f32.mxu1 %vm3042_vm15, %v3036_v36 }
0x1555   :  { %2718 = vmatprep.subr.mxu1 %v3036_v36 }
0x1558   :  { %2719 = vmatpush3.msk.msra.mxu1 %vm703_vm1, %v3408_v38 }
0x1559   :  { %2829 = vmatprep.subr.bf16.mxu1 %v3040_v39 }
0x1626   :  { %v1740_v48 = vpop.f32.mrb[14].mxu1 }
0x1627   :  { %v1741_v44 = vadd.f32 %v1740_v48, %v3486_v26  ;;  %v2704_v49 = vpop.f32.mrb[15].mxu1 }
0x1629   :  { %v1744_v6 = vmax.f32 %v1741_v44, 0.0 }
0x162b   :  { %2712 = vmatmul.mubr.msk.f32.vlgmr.msra.gmra.mrb[28].mxu0 %vm686_vm2, %v1744_v6 }
0x162c   :  { %2828 = vmatpush3.bf16.msra.mxu0 %v3324_v63  ;;  %2729 = vmatprep.mubr.msk.f32.mxu0 %vm3042_vm15, %v3036_v36 }
0x162d   :  { %2727 = vmatprep.subr.mxu0 %v3036_v36 }
0x1630   :  { %2728 = vmatpush3.msk.msra.mxu0 %vm703_vm1, %v3317_v57 }
0x1631   :  { %2832 = vmatprep.subr.bf16.mxu0 %v3040_v39 }
0x16fe   :  { %v1814_v54 = vpop.f32.mrb[28].mxu0 }
0x16ff   :  { %v1815_v5 = vadd.f32 %v1814_v54, %v3353_v22  ;;  %v2713_v27 = vpop.f32.mrb[29].mxu0 }
0x1701   :  { %1826 = vrot.lane.b32.xlu0 %v1815_v5, %s3035_s0  ;;  %v1818_v52 = vadd.f32 %v1815_v5, %v798_v50 }
0x1703   :  { %v2428_v8 = vmul.f32 -1.442695, %v1818_v52 }
0x1705   :  { %2991 = vpow2.f32 %v2428_v8 }
0x170f   :  { %v2992_v17 = vpop.eup %2991 }
0x1710   :  { %v1822_v19 = vadd.f32 1.0, %v2992_v17 }
0x1712   :  { %2993 = vrcp.f32 %v1822_v19 }
0x171c   :  { %v2994_v35 = vpop.eup %2993 }
0x171d   :  { %v1836_v41 = vsub.f32 1.0, %v2994_v35 }
0x1773   :  { %v1827_v58 = vpop.permute.xlu0 %1826 }
0x1774   :  { %v1829_v59 = vmul.f32 %v2994_v35, %v1827_v58 }
0x1776   :  { %1831 = vrot.lane.b32.xlu1 %v1829_v59, %s3039_s10 }
0x177a   :  { %1842 = vrot.lane.b32.xlu1 %v1744_v6, %s3046_s1 }
0x17e8   :  { %v1832_v39 = vpop.permute.xlu1 %1831 }
0x17e9   :  { %v1834_v61 = vadd.f32 %v1832_v39, %v798_v50  ;;  %v808_v50 = vadd.f32 %v3506_v46, %v3358_v42 }
0x17eb   :  { %2995 = vtanh.f32 %v1834_v61 }
0x17ec   :  { %v1843_v16 = vpop.permute.xlu1 %1842 }
0x17ed   :  { %v1845_v15 = vmul.f32 %v2994_v35, %v1843_v16 }
0x17f5   :  { %v2996_v0 = vpop.eup %2995 }
0x17f6   :  { %1838 = vrot.lane.b32.xlu0 %v2996_v0, %s3041_s15 }
0x1868   :  { %v1839_v28 = vpop.permute.xlu0 %1838 }
0x1869   :  { %v1841_v1 = vmul.f32 %v1839_v28, %v1836_v41 }
0x186b   :  { %v1846_v2 = vadd.f32 %v1845_v15, %v1841_v1 }
0x186d   :  { %1848 = vrot.lane.b32.xlu0 %v1846_v2, %s3041_s15 }
0x18df   :  { %v3629_v62 = vpop.permute.xlu0 %1848 }
0x18e0   :  { %2721 = vmatmul.mubr.msk.f32.vlgmr.msra.gmra.mrb[16].mxu1 %vm686_vm2, %v3629_v62 }
0x18e1   :  { %2831 = vmatpush3.bf16.msra.mxu1 %v3401_v34  ;;  %2738 = vmatprep.mubr.msk.f32.mxu1 %vm3042_vm15, %v3036_v36 }
0x18e2   :  { %2736 = vmatprep.subr.mxu1 %v3036_v36 }
0x18e5   :  { %2737 = vmatpush3.msk.msra.mxu1 %vm703_vm1, %v3408_v38 }
0x19b3   :  { %v1918_v9 = vpop.f32.mrb[16].mxu1 }
0x19b4   :  { %v1919_v4 = vadd.f32 %v1918_v9, %v3486_v26  ;;  %v2722_v7 = vpop.f32.mrb[17].mxu1 }
0x19b6   :  { %v1922_v14 = vmax.f32 %v1919_v4, 0.0 }
0x19b8   :  { %2730 = vmatmul.mubr.msk.f32.vlgmr.msra.gmra.mrb[30].mxu0 %vm686_vm2, %v1922_v14 }
0x19b9   :  { %2834 = vmatpush3.bf16.msra.mxu0 %v3324_v63  ;;  %2747 = vmatprep.mubr.msk.f32.mxu0 %vm3042_vm15, %v3036_v36 }
0x19ba   :  { %2745 = vmatprep.subr.mxu0 %v3036_v36 }
0x19bd   :  { %2746 = vmatpush3.msk.msra.mxu0 %vm703_vm1, %v3317_v57 }
0x1a8b   :  { %v1992_v34 = vpop.f32.mrb[30].mxu0 }
0x1a8c   :  { %v1993_v38 = vadd.f32 %v1992_v34, %v3353_v22  ;;  %v2731_v18 = vpop.f32.mrb[31].mxu0 }
0x1a8e   :  { %2004 = vrot.lane.b32.xlu1 %v1993_v38, %s3035_s0  ;;  %v1996_v10 = vadd.f32 %v1993_v38, %v803_v20 }
0x1a90   :  { %v2433_v11 = vmul.f32 -1.442695, %v1996_v10 }
0x1a92   :  { %2997 = vpow2.f32 %v2433_v11 }
0x1a9c   :  { %v2998_v63 = vpop.eup %2997 }
0x1a9d   :  { %v2000_v60 = vadd.f32 1.0, %v2998_v63 }
0x1a9f   :  { %2999 = vrcp.f32 %v2000_v60 }
0x1aa9   :  { %v3000_v13 = vpop.eup %2999 }
0x1aaa   :  { %v2014_v31 = vsub.f32 1.0, %v3000_v13 }
0x1b00   :  { %v2005_v36 = vpop.permute.xlu1 %2004 }
0x1b01   :  { %v2007_v30 = vmul.f32 %v3000_v13, %v2005_v36 }
0x1b03   :  { %2009 = vrot.lane.b32.xlu0 %v2007_v30, %s3039_s10 }
0x1b07   :  { %2020 = vrot.lane.b32.xlu0 %v1922_v14, %s3046_s1 }
0x1b75   :  { %v2010_v57 = vpop.permute.xlu0 %2009 }
0x1b76   :  { %v2012_v21 = vadd.f32 %v2010_v57, %v803_v20 }
0x1b78   :  { %3001 = vtanh.f32 %v2012_v21 }
0x1b79   :  { %v2021_v32 = vpop.permute.xlu0 %2020 }
0x1b7a   :  { %v2023_v24 = vmul.f32 %v3000_v13, %v2021_v32 }
0x1b82   :  { %v3002_v37 = vpop.eup %3001 }
0x1b83   :  { %2016 = vrot.lane.b32.xlu1 %v3002_v37, %s3041_s15 }
0x1bf5   :  { %v2017_v23 = vpop.permute.xlu1 %2016 }
0x1bf6   :  { %v2019_v29 = vmul.f32 %v2017_v23, %v2014_v31 }
0x1bf8   :  { %v2024_v45 = vadd.f32 %v2023_v24, %v2019_v29 }
0x1bfa   :  { %2026 = vrot.lane.b32.xlu1 %v2024_v45, %s3041_s15 }
0x1c6c   :  { %v2027_v47 = vpop.permute.xlu1 %2026 }
0x1c6d   :  { %2739 = vmatmul.mubr.msk.f32.vlgmr.msra.gmra.mrb[18].mxu1 %vm686_vm2, %v2027_v47 }
0x1c6e   :  { %2756 = vmatprep.mubr.msk.f32.mxu1 %vm686_vm2, %v3423_v51 }
0x1d40   :  { %v2096_v48 = vpop.f32.mrb[18].mxu1 }
0x1d41   :  { %v2097_v44 = vadd.f32 %v2096_v48, %v3486_v26  ;;  %v2740_v49 = vpop.f32.mrb[19].mxu1 }
0x1d43   :  { %v2100_v6 = vmax.f32 %v2097_v44, 0.0 }
0x1d45   :  { %2748 = vmatmul.mubr.msk.f32.vlgmr.msra.gmra.mrb[32].mxu0 %vm686_vm2, %v2100_v6 }
0x1e18   :  { %v2170_v54 = vpop.f32.mrb[32].mxu0 }
0x1e19   :  { %v2171_v5 = vadd.f32 %v2170_v54, %v3353_v22  ;;  %v2749_v27 = vpop.f32.mrb[33].mxu0 }
0x1e1b   :  { %2182 = vrot.lane.b32.xlu0 %v2171_v5, %s3035_s0  ;;  %v2174_v52 = vadd.f32 %v2171_v5, %v808_v50 }
0x1e1d   :  { %v2438_v8 = vmul.f32 -1.442695, %v2174_v52 }
0x1e1f   :  { %3003 = vpow2.f32 %v2438_v8 }
0x1e29   :  { %v3004_v51 = vpop.eup %3003 }
0x1e2a   :  { %v2178_v17 = vadd.f32 1.0, %v3004_v51 }
0x1e2c   :  { %3005 = vrcp.f32 %v2178_v17 }
0x1e36   :  { %v3006_v26 = vpop.eup %3005 }
0x1e37   :  { %v2192_v59 = vsub.f32 1.0, %v3006_v26 }
0x1e8d   :  { %v2183_v19 = vpop.permute.xlu0 %2182 }
0x1e8e   :  { %v2185_v35 = vmul.f32 %v3006_v26, %v2183_v19 }
0x1e90   :  { %2187 = vrot.lane.b32.xlu1 %v2185_v35, %s3039_s10 }
0x1e94   :  { %2198 = vrot.lane.b32.xlu1 %v2100_v6, %s3046_s1 }
0x1e98   :  { %2210 = vrot.lane.b32.xlu1 %v3388_v40, %s3047_s3 }
0x1e9c   :  { %2214 = vrot.lane.b32.xlu1 %v3465_v12, %s3047_s3 }
0x1f02   :  { %v2188_v22 = vpop.permute.xlu1 %2187 }
0x1f03   :  { %v2190_v42 = vadd.f32 %v2188_v22, %v808_v50 }
0x1f05   :  { %3007 = vtanh.f32 %v2190_v42 }
0x1f06   :  { %v2199_v58 = vpop.permute.xlu1 %2198 }
0x1f07   :  { %v2201_v61 = vmul.f32 %v3006_v26, %v2199_v58 }
0x1f0a   :  { %v2211_v15 = vpop.permute.xlu1 %2210 }
0x1f0e   :  { %v2215_v53 = vpop.permute.xlu1 %2214 }
0x1f0f   :  { %v3008_v46 = vpop.eup %3007 }
0x1f10   :  { %2194 = vrot.lane.b32.xlu0 %v3008_v46, %s3041_s15 }
0x1f14   :  { %2909 = vrot.lane.b32.xlu0 %v2908_v55, %s3047_s3 }
0x1f82   :  { %v2195_v39 = vpop.permute.xlu0 %2194 }
0x1f83   :  { %v2197_v0 = vmul.f32 %v2195_v39, %v2192_v59 }
0x1f85   :  { %v2202_v16 = vadd.f32 %v2201_v61, %v2197_v0 }
0x1f86   :  { %v2910_v41 = vpop.permute.xlu0 %2909 }
0x1f87   :  { %v2912_v40 = vunpack.i.h.bf16 %v2910_v41  ;;  %v2911_v28 = vunpack.i.l.bf16 %v2910_v41  ;;  %2204 = vrot.lane.b32.xlu0 %v2202_v16, %s3041_s15 }
0x1f89   :  { %v2835_v12 = vpack.c.bf16 %v2912_v40, %v2911_v28 }
0x1f8b   :  { %2836 = vmatprep.subr.bf16.mxu1 %v2835_v12 }
0x1f8c   :  { %2838 = vmatpush3.bf16.msra.mxu1 %v2835_v12 }
0x1f8d   :  { %2754 = vmatprep.subr.msk.mxu1 %vm703_vm1, %v2211_v15 }
0x1f90   :  { %2755 = vmatpush3.msk.msra.mxu1 %vm703_vm1, %v2211_v15 }
0x1f91   :  { %2757 = vmatmul.mubr.msk.f32.vlgmr.msra.gmra.mrb[20].mxu1 %vm686_vm2, %v3518_v25 }
0x1f92   :  { %2759 = vmatprep.mubr.msk.f32.mxu1 %vm686_vm2, %v3545_v56 }
0x1f95   :  { %2760 = vmatmul.mubr.msk.f32.gmra.mrb[22].mxu1 %vm686_vm2, %v3573_v43 }
0x1f96   :  { %2762 = vmatprep.mubr.msk.f32.mxu1 %vm686_vm2, %v3601_v33 }
0x1f99   :  { %2763 = vmatmul.mubr.msk.f32.gmra.mrb[24].mxu1 %vm686_vm2, %v3629_v62 }
0x1f9a   :  { %2765 = vmatprep.mubr.msk.f32.mxu1 %vm686_vm2, %v2027_v47 }
0x1ff9   :  { %v2205_v3 = vpop.permute.xlu0 %2204 }
0x1ffa   :  { %2766 = vmatmul.mubr.msk.f32.gmra.mrb[26].mxu1 %vm686_vm2, %v2205_v3 }
0x2064   :  { %v2758_v55 = vpop.f32.mrb[20].mxu1 }
0x2065   :  { %v2293_v25 = vadd.f32 %v2758_v55, %v2215_v53  ;;  %v2287_v1 = vpop.f32.mrb[21].mxu1 }
0x2066   :  { %v2288_v56 = vadd.f32 %v2287_v1, %v2215_v53 }
0x2067   :  { %2328 = vst.msk [vmem:[#allocation2 + $0x8] sm:$0xff] %vm2326_vm4, %v2293_v25 }
0x2068   :  { %2327 = vst.msk [vmem:[#allocation2] sm:$0xff] %vm2326_vm4, %v2288_v56  ;;  %v2761_v43 = vpop.f32.mrb[22].mxu1 }
0x2069   :  { %v2303_v33 = vadd.f32 %v2761_v43, %v2215_v53  ;;  %v2297_v2 = vpop.f32.mrb[23].mxu1 }
0x206a   :  { %v2298_v9 = vadd.f32 %v2297_v2, %v2215_v53 }
0x206b   :  { %2330 = vst.msk [vmem:[#allocation2 + $0x18] sm:$0xff] %vm2326_vm4, %v2303_v33 }
0x206c   :  { %2329 = vst.msk [vmem:[#allocation2 + $0x10] sm:$0xff] %vm2326_vm4, %v2298_v9  ;;  %v2764_v62 = vpop.f32.mrb[24].mxu1 }
0x206d   :  { %v2313_v4 = vadd.f32 %v2764_v62, %v2215_v53  ;;  %v2307_v7 = vpop.f32.mrb[25].mxu1 }
0x206e   :  { %v2308_v14 = vadd.f32 %v2307_v7, %v2215_v53 }
0x206f   :  { %2332 = vst.msk [vmem:[#allocation2 + $0x28] sm:$0xff] %vm2326_vm4, %v2313_v4 }
0x2070   :  { %2331 = vst.msk [vmem:[#allocation2 + $0x20] sm:$0xff] %vm2326_vm4, %v2308_v14 }
0x20cd   :  { %v2767_v34 = vpop.f32.mrb[26].mxu1 }
0x20ce   :  { %v2323_v38 = vadd.f32 %v2767_v34, %v2215_v53  ;;  %v2317_v18 = vpop.f32.mrb[27].mxu1 }
0x20cf   :  { %v2318_v20 = vadd.f32 %v2317_v18, %v2215_v53 }
0x20d0   :  { %2334 = vst.msk [vmem:[#allocation2 + $0x38] sm:$0xff] %vm2326_vm4, %v2323_v38 }
0x20d1   :  { %2333 = vst.msk [vmem:[#allocation2 + $0x30] sm:$0xff] %vm2326_vm4, %v2318_v20 }
0x20d2   :  { %3020 = shalt.err (!%p3017_p4)
}
0x20d3   :  { %s3021_s0 = scalar_lea.hbm %s3709_s2, 1024 }
0x20d4   :  { %p3022_p5 = scmp.ne.s32.totalorder %s3709_s2, %s3021_s0  ;;  %p3025_p6 = scmp.lt.u32.totalorder %s3021_s0, %s3709_s2 }
0x20d6   :  { %p3027_p7 = pnand %p3025_p6, %p3022_p5 }
0x20d8   :  { %3030 = shalt.err (!%p3027_p7)
}
0x20d9   :  { %s3049_s13 = smov 128   ;;  %s3050_s14 = smov 8  }
0x20da   :  { %2346 = dma.vmem_to_hbm [thread:$0]  %s2341_s5, 1024, %s3709_s2, [#allocation3], %s3049_s13, %s3049_s13, %s3050_s14  }
0x20db   :  { %3031 = dma.done.wait [#allocation3], 1024  }
0x20dc   :  { %3032 = vsyncadd [#allocation3], 4294966272 }
0x20dd   :  { %2350 = vsyncpa [#allocation3], 1 }

</bundles_post_ra>
